<compile_context>
chip_gen: v5e
topology: v5e:2x2
jax: 0.10.0
libtpu: 0.0.40
codegen_flags: <defaults>
</compile_context>

<pallas_src>
import jax
import jax.numpy as jnp
from jax.experimental import pallas as pl
from jax.experimental.pallas import tpu as pltpu

_UNROLL_MAX_T = 64  # static unroll up to here; lax.fori_loop beyond


def lstm_model_kernel(x_ref, w1_ref, b1_ref,
                      wih0_ref, whh0_ref, bg0_ref,
                      wihh1_ref, bg1_ref,
                      w2_ref, b2_ref,
                      out_ref, gx_ref):
    x = x_ref[...].astype(jnp.float32)              # (B, T)
    B, T = x.shape
    H = w1_ref.shape[1]
    G = 4 * H                                       # 128 lanes for H=32 -> one vreg wide

    # ---- normalize(): per-sample mean / unbiased std over flattened sequence ----
    mean = jnp.mean(x, axis=1, keepdims=True)                           # (B, 1)
    var = jnp.sum((x - mean) ** 2, axis=1, keepdims=True) / (T - 1)     # torch.std (unbiased)
    inv_std = jax.lax.rsqrt(var)                                        # EUP rsqrt, no divide
    std = jnp.sqrt(var)                                                 # exact, for inverse()
    xn = (x - mean) * inv_std                                           # (B, T)

    # ---- weights; biases pre-broadcast ONCE (hoisted out of the unrolled loop) ----
    w1 = jnp.broadcast_to(w1_ref[...], (B, H))       # (B, H)
    b1 = jnp.broadcast_to(b1_ref[...], (B, H))       # (B, H)
    wih0 = wih0_ref[...]                             # (H, 4H)
    whh0 = whh0_ref[...]                             # (H, 4H)
    bg0 = bg0_ref[...]                               # (1, 4H)
    wihh1 = wihh1_ref[...]                           # (2H, 4H) = [wih1; whh1] fused
    bg1 = jnp.broadcast_to(bg1_ref[...], (B, G))     # (B, 4H)

    # ---- hoist linear_1 + ReLU + layer-0 input projection out of the recurrence:
    #      a single (T*B, H) @ (H, 4H) matmul replaces T MXU pushes on the serial
    #      chain. Rows are time-major: row t*B + b = timestep t of sample b. ----
    u_rows = jnp.concatenate(
        [jnp.maximum(xn[:, t:t + 1] * w1 + b1, 0.0) for t in range(T)], axis=0)   # (T*B, H)
    gx_flat = jnp.dot(u_rows, wih0, preferred_element_type=jnp.float32) + bg0     # (T*B, 4H)

    def sigmoid(z):
        # exp on the EUP; the divide becomes an approx reciprocal (also EUP, near-free)
        return pl.reciprocal(1.0 + jnp.exp(-z), approx=True)

    def apply_gates(g, c_prev):
        # Activate the whole 4H-wide gate vector once, then slice (PyTorch order i, f, g, o):
        # 2 transcendental pushes per cell instead of 4.
        s = sigmoid(g)                                                   # (B, 4H)
        th = jnp.tanh(g)                                                 # (B, 4H)
        c_new = s[:, H:2 * H] * c_prev + s[:, 0:H] * th[:, 2 * H:3 * H]
        h_new = s[:, 3 * H:4 * H] * jnp.tanh(c_new)
        return h_new, c_new

    def step(gx_t, h0, c0, h1, c1):
        # layer 0: input part precomputed -> only the recurrent dot on the serial chain
        g0 = gx_t + jnp.dot(h0, whh0, preferred_element_type=jnp.float32)
        h0, c0 = apply_gates(g0, c0)
        # layer 1: fused weights -> one (B, 2H) @ (2H, 4H) dot instead of two K=H dots
        g1 = jnp.dot(jnp.concatenate([h0, h1], axis=1), wihh1,
                     preferred_element_type=jnp.float32) + bg1
        h1, c1 = apply_gates(g1, c1)
        return h0, c0, h1, c1

    zeros = jnp.zeros((B, H), jnp.float32)
    h0, c0, h1, c1 = zeros, zeros, zeros, zeros

    if T <= _UNROLL_MAX_T:
        # small T: full static unroll, all slices static
        for t in range(T):
            h0, c0, h1, c1 = step(gx_flat[t * B:(t + 1) * B, :], h0, c0, h1, c1)
    else:
        # long sequences: fori_loop bounds vreg live ranges / code size; per-step
        # precomputed gates are read back from a VMEM scratch with a dynamic slice.
        gx_ref[...] = gx_flat

        def body(t, carry):
            h0, c0, h1, c1 = carry
            start = pl.multiple_of(t * B, B)
            gx_t = gx_ref[pl.ds(start, B), :]
            return step(gx_t, h0, c0, h1, c1)

        h0, c0, h1, c1 = jax.lax.fori_loop(0, T, body, (h0, c0, h1, c1))

    # h_n.permute(1,0,2).reshape(B, num_layers*H) == concat([h_layer0, h_layer1], axis=-1)
    feat = jnp.concatenate([h0, h1], axis=1)                             # (B, 2H)
    # TODO(synk): nn.Dropout implemented as identity (inference semantics); stochastic
    # training-mode dropout omitted.
    # linear_2 with output_size=1: VPU multiply + lane reduction (skip an N=1 MXU push).
    pred = jnp.sum(feat * w2_ref[...], axis=1, keepdims=True) + b2_ref[...]   # (B, 1)
    pred = pred * std + mean                                             # inverse()
    out_ref[...] = pred.astype(out_ref.dtype)


def init_params(key, input_size=1, hidden=32, num_layers=2, output_size=1):
    """Deterministic parameter init matching the module's shapes / init_weights spirit."""
    assert num_layers == 2
    H = hidden
    ks = jax.random.split(key, 8)

    # linear_1 (torch default uniform init); stored transposed: (input_size, H)
    lim1 = 1.0 / jnp.sqrt(jnp.float32(input_size))
    w1 = jax.random.uniform(ks[0], (input_size, H), jnp.float32, -lim1, lim1)
    b1 = jax.random.uniform(ks[1], (1, H), jnp.float32, -lim1, lim1)

    def kaiming_T(k, fan_in, fan_out):
        # weight_ih kaiming_normal_, stored transposed (fan_in, fan_out)
        return jax.random.normal(k, (fan_in, fan_out), jnp.float32) * jnp.sqrt(2.0 / fan_in)

    def orthogonal_T(k, rows, cols):
        # weight_hh orthogonal_ on (rows, cols); stored transposed (cols, rows)
        a = jax.random.normal(k, (rows, cols), jnp.float32)
        q, _ = jnp.linalg.qr(a)
        return q.T

    wih0 = kaiming_T(ks[2], H, 4 * H)          # lstm layer0 input size == H (after linear_1)
    whh0 = orthogonal_T(ks[3], 4 * H, H)
    bg0 = jnp.zeros((1, 4 * H), jnp.float32)   # bias_ih + bias_hh, both constant_(0.0)

    wih1 = kaiming_T(ks[4], H, 4 * H)
    whh1 = orthogonal_T(ks[5], 4 * H, H)
    bg1 = jnp.zeros((1, 4 * H), jnp.float32)

    # linear_2 (torch default uniform); stored transposed: (num_layers*H, output_size)
    lim2 = 1.0 / jnp.sqrt(jnp.float32(num_layers * H))
    w2 = jax.random.uniform(ks[6], (num_layers * H, output_size), jnp.float32, -lim2, lim2)
    b2 = jax.random.uniform(ks[7], (1, output_size), jnp.float32, -lim2, lim2)

    return dict(w1=w1, b1=b1, wih0=wih0, whh0=whh0, bg0=bg0,
                wih1=wih1, whh1=whh1, bg1=bg1, w2=w2, b2=b2)


def lstm_model_forward(x, params):
    """x: (B, T, F) float32 with F == 1. Returns predictions[:, -1] of shape (B,)."""
    B, T, F = x.shape
    assert F == 1, "module is built with input_size=1"
    x2d = x.reshape(B, T).astype(jnp.float32)

    H = params["w1"].shape[1]
    # fuse layer-1 input/recurrent weights so the kernel does one dot per step
    wihh1 = jnp.concatenate([params["wih1"], params["whh1"]], axis=0)    # (2H, 4H)
    # linear_2 as a row vector (output_size == 1) for the VPU mul + lane-reduce epilogue
    w2_row = params["w2"].T                                              # (1, 2H)

    args = (x2d,
            params["w1"], params["b1"],
            params["wih0"], params["whh0"], params["bg0"],
            wihh1, params["bg1"],
            w2_row, params["b2"])

    in_specs = [pl.BlockSpec(a.shape, lambda i, nd=a.ndim: (0,) * nd) for a in args]

    # NOTE: grid=(1,) is appropriate while B is tiny. For real batch sizes, add a
    # leading "parallel" grid axis blocking x/out over B (weights' index_maps stay
    # (0, ...) so they remain VMEM-resident) so v7x's second TensorCore is used.
    out = pl.pallas_call(
        lstm_model_kernel,
        out_shape=jax.ShapeDtypeStruct((B, 1), jnp.float32),
        grid=(1,),
        in_specs=in_specs,
        out_specs=pl.BlockSpec((B, 1), lambda i: (0, 0)),
        scratch_shapes=[pltpu.VMEM((T * B, 4 * H), jnp.float32)],
        compiler_params=pltpu.CompilerParams(dimension_semantics=("arbitrary",)),
    )(*args)
    return out[:, -1]   # predictions[:, -1]


if __name__ == "__main__":
    key = jax.random.PRNGKey(0)
    k_param, k_data = jax.random.split(key)

    B, T, F = 2, 8, 1
    params = init_params(k_param, input_size=F, hidden=32, num_layers=2, output_size=1)
    x = jax.random.normal(k_data, (B, T, F), dtype=jnp.float32)

    preds = lstm_model_forward(x, params)
    jax.block_until_ready(preds)
    assert preds.shape == (B,)
    print("KERNEL_OK")
</pallas_src>

<mosaic_0001>
module attributes {stable_mosaic.version = 11 : i64} {
  func.func @lstm_model_kernel(%arg0: i32, %arg1: memref<2x8xf32, #tpu.memory_space<vmem>>, %arg2: memref<1x32xf32, #tpu.memory_space<vmem>>, %arg3: memref<1x32xf32, #tpu.memory_space<vmem>>, %arg4: memref<32x128xf32, #tpu.memory_space<vmem>>, %arg5: memref<32x128xf32, #tpu.memory_space<vmem>>, %arg6: memref<1x128xf32, #tpu.memory_space<vmem>>, %arg7: memref<64x128xf32, #tpu.memory_space<vmem>>, %arg8: memref<1x128xf32, #tpu.memory_space<vmem>>, %arg9: memref<1x64xf32, #tpu.memory_space<vmem>>, %arg10: memref<1x1xf32, #tpu.memory_space<vmem>>, %arg11: memref<2x1xf32, #tpu.memory_space<vmem>>, %arg12: memref<16x128xf32, #tpu.memory_space<vmem>>) attributes {dimension_semantics = [#tpu.dimension_semantics<arbitrary>], iteration_bounds = array<i64: 1>, scalar_prefetch = 0 : i64, scratch_operands = 1 : i64, tpu.core_type = #tpu.core_type<tc>, window_params = [{pipeline_mode = #tpu.pipeline_mode<synchronous>, transform_indices = @transform_0, window_bounds = array<i64: 2, 8>}, {pipeline_mode = #tpu.pipeline_mode<synchronous>, transform_indices = @transform_1, window_bounds = array<i64: 1, 32>}, {pipeline_mode = #tpu.pipeline_mode<synchronous>, transform_indices = @transform_2, window_bounds = array<i64: 1, 32>}, {pipeline_mode = #tpu.pipeline_mode<synchronous>, transform_indices = @transform_3, window_bounds = array<i64: 32, 128>}, {pipeline_mode = #tpu.pipeline_mode<synchronous>, transform_indices = @transform_4, window_bounds = array<i64: 32, 128>}, {pipeline_mode = #tpu.pipeline_mode<synchronous>, transform_indices = @transform_5, window_bounds = array<i64: 1, 128>}, {pipeline_mode = #tpu.pipeline_mode<synchronous>, transform_indices = @transform_6, window_bounds = array<i64: 64, 128>}, {pipeline_mode = #tpu.pipeline_mode<synchronous>, transform_indices = @transform_7, window_bounds = array<i64: 1, 128>}, {pipeline_mode = #tpu.pipeline_mode<synchronous>, transform_indices = @transform_8, window_bounds = array<i64: 1, 64>}, {pipeline_mode = #tpu.pipeline_mode<synchronous>, transform_indices = @transform_9, window_bounds = array<i64: 1, 1>}, {pipeline_mode = #tpu.pipeline_mode<synchronous>, transform_indices = @transform_10, window_bounds = array<i64: 2, 1>}]} {
    %c0 = arith.constant 0 : index
    %c0_0 = arith.constant 0 : index
    %0 = vector.load %arg1[%c0, %c0_0] : memref<2x8xf32, #tpu.memory_space<vmem>>, vector<2x8xf32>
    %cst = arith.constant dense<0.000000e+00> : vector<2xf32>
    %1 = vector.multi_reduction <add>, %0, %cst [1] : vector<2x8xf32> to vector<2xf32>
    %2 = vector.shape_cast %1 : vector<2xf32> to vector<2x1xf32>
    %cst_1 = arith.constant 8.000000e+00 : f32
    %3 = vector.broadcast %cst_1 : f32 to vector<2x1xf32>
    %4 = arith.divf %2, %3 : vector<2x1xf32>
    %5 = vector.broadcast %4 : vector<2x1xf32> to vector<2x8xf32>
    %6 = arith.subf %0, %5 : vector<2x8xf32>
    %7 = arith.mulf %6, %6 : vector<2x8xf32>
    %cst_2 = arith.constant dense<0.000000e+00> : vector<2xf32>
    %8 = vector.multi_reduction <add>, %7, %cst_2 [1] : vector<2x8xf32> to vector<2xf32>
    %9 = vector.shape_cast %8 : vector<2xf32> to vector<2x1xf32>
    %cst_3 = arith.constant 7.000000e+00 : f32
    %10 = vector.broadcast %cst_3 : f32 to vector<2x1xf32>
    %11 = arith.divf %9, %10 : vector<2x1xf32>
    %12 = math.rsqrt %11 : vector<2x1xf32>
    %13 = math.sqrt %11 : vector<2x1xf32>
    %14 = vector.broadcast %4 : vector<2x1xf32> to vector<2x8xf32>
    %15 = arith.subf %0, %14 : vector<2x8xf32>
    %16 = vector.broadcast %12 : vector<2x1xf32> to vector<2x8xf32>
    %17 = arith.mulf %15, %16 : vector<2x8xf32>
    %c0_4 = arith.constant 0 : index
    %c0_5 = arith.constant 0 : index
    %18 = vector.load %arg2[%c0_4, %c0_5] : memref<1x32xf32, #tpu.memory_space<vmem>>, vector<1x32xf32>
    %19 = vector.shape_cast %18 : vector<1x32xf32> to vector<1x32xf32>
    %20 = vector.broadcast %19 : vector<1x32xf32> to vector<2x32xf32>
    %c0_6 = arith.constant 0 : index
    %c0_7 = arith.constant 0 : index
    %21 = vector.load %arg3[%c0_6, %c0_7] : memref<1x32xf32, #tpu.memory_space<vmem>>, vector<1x32xf32>
    %22 = vector.shape_cast %21 : vector<1x32xf32> to vector<1x32xf32>
    %23 = vector.broadcast %22 : vector<1x32xf32> to vector<2x32xf32>
    %c0_8 = arith.constant 0 : index
    %c0_9 = arith.constant 0 : index
    %24 = vector.load %arg4[%c0_8, %c0_9] : memref<32x128xf32, #tpu.memory_space<vmem>>, vector<32x128xf32>
    %c0_10 = arith.constant 0 : index
    %c0_11 = arith.constant 0 : index
    %25 = vector.load %arg5[%c0_10, %c0_11] : memref<32x128xf32, #tpu.memory_space<vmem>>, vector<32x128xf32>
    %c0_12 = arith.constant 0 : index
    %c0_13 = arith.constant 0 : index
    %26 = vector.load %arg6[%c0_12, %c0_13] : memref<1x128xf32, #tpu.memory_space<vmem>>, vector<1x128xf32>
    %c0_14 = arith.constant 0 : index
    %c0_15 = arith.constant 0 : index
    %27 = vector.load %arg7[%c0_14, %c0_15] : memref<64x128xf32, #tpu.memory_space<vmem>>, vector<64x128xf32>
    %c0_16 = arith.constant 0 : index
    %c0_17 = arith.constant 0 : index
    %28 = vector.load %arg8[%c0_16, %c0_17] : memref<1x128xf32, #tpu.memory_space<vmem>>, vector<1x128xf32>
    %29 = vector.shape_cast %28 : vector<1x128xf32> to vector<1x128xf32>
    %30 = vector.broadcast %29 : vector<1x128xf32> to vector<2x128xf32>
    %31 = vector.extract_strided_slice %17 {offsets = [0, 0], sizes = [2, 1], strides = [1, 1]} : vector<2x8xf32> to vector<2x1xf32>
    %32 = vector.broadcast %31 : vector<2x1xf32> to vector<2x32xf32>
    %33 = arith.mulf %32, %20 : vector<2x32xf32>
    %34 = arith.addf %33, %23 : vector<2x32xf32>
    %cst_18 = arith.constant 0.000000e+00 : f32
    %35 = vector.broadcast %cst_18 : f32 to vector<2x32xf32>
    %36 = arith.maximumf %34, %35 : vector<2x32xf32>
    %37 = vector.extract_strided_slice %17 {offsets = [0, 1], sizes = [2, 1], strides = [1, 1]} : vector<2x8xf32> to vector<2x1xf32>
    %38 = vector.broadcast %37 : vector<2x1xf32> to vector<2x32xf32>
    %39 = arith.mulf %38, %20 : vector<2x32xf32>
    %40 = arith.addf %39, %23 : vector<2x32xf32>
    %cst_19 = arith.constant 0.000000e+00 : f32
    %41 = vector.broadcast %cst_19 : f32 to vector<2x32xf32>
    %42 = arith.maximumf %40, %41 : vector<2x32xf32>
    %43 = vector.extract_strided_slice %17 {offsets = [0, 2], sizes = [2, 1], strides = [1, 1]} : vector<2x8xf32> to vector<2x1xf32>
    %44 = vector.broadcast %43 : vector<2x1xf32> to vector<2x32xf32>
    %45 = arith.mulf %44, %20 : vector<2x32xf32>
    %46 = arith.addf %45, %23 : vector<2x32xf32>
    %cst_20 = arith.constant 0.000000e+00 : f32
    %47 = vector.broadcast %cst_20 : f32 to vector<2x32xf32>
    %48 = arith.maximumf %46, %47 : vector<2x32xf32>
    %49 = vector.extract_strided_slice %17 {offsets = [0, 3], sizes = [2, 1], strides = [1, 1]} : vector<2x8xf32> to vector<2x1xf32>
    %50 = vector.broadcast %49 : vector<2x1xf32> to vector<2x32xf32>
    %51 = arith.mulf %50, %20 : vector<2x32xf32>
    %52 = arith.addf %51, %23 : vector<2x32xf32>
    %cst_21 = arith.constant 0.000000e+00 : f32
    %53 = vector.broadcast %cst_21 : f32 to vector<2x32xf32>
    %54 = arith.maximumf %52, %53 : vector<2x32xf32>
    %55 = vector.extract_strided_slice %17 {offsets = [0, 4], sizes = [2, 1], strides = [1, 1]} : vector<2x8xf32> to vector<2x1xf32>
    %56 = vector.broadcast %55 : vector<2x1xf32> to vector<2x32xf32>
    %57 = arith.mulf %56, %20 : vector<2x32xf32>
    %58 = arith.addf %57, %23 : vector<2x32xf32>
    %cst_22 = arith.constant 0.000000e+00 : f32
    %59 = vector.broadcast %cst_22 : f32 to vector<2x32xf32>
    %60 = arith.maximumf %58, %59 : vector<2x32xf32>
    %61 = vector.extract_strided_slice %17 {offsets = [0, 5], sizes = [2, 1], strides = [1, 1]} : vector<2x8xf32> to vector<2x1xf32>
    %62 = vector.broadcast %61 : vector<2x1xf32> to vector<2x32xf32>
    %63 = arith.mulf %62, %20 : vector<2x32xf32>
    %64 = arith.addf %63, %23 : vector<2x32xf32>
    %cst_23 = arith.constant 0.000000e+00 : f32
    %65 = vector.broadcast %cst_23 : f32 to vector<2x32xf32>
    %66 = arith.maximumf %64, %65 : vector<2x32xf32>
    %67 = vector.extract_strided_slice %17 {offsets = [0, 6], sizes = [2, 1], strides = [1, 1]} : vector<2x8xf32> to vector<2x1xf32>
    %68 = vector.broadcast %67 : vector<2x1xf32> to vector<2x32xf32>
    %69 = arith.mulf %68, %20 : vector<2x32xf32>
    %70 = arith.addf %69, %23 : vector<2x32xf32>
    %cst_24 = arith.constant 0.000000e+00 : f32
    %71 = vector.broadcast %cst_24 : f32 to vector<2x32xf32>
    %72 = arith.maximumf %70, %71 : vector<2x32xf32>
    %73 = vector.extract_strided_slice %17 {offsets = [0, 7], sizes = [2, 1], strides = [1, 1]} : vector<2x8xf32> to vector<2x1xf32>
    %74 = vector.broadcast %73 : vector<2x1xf32> to vector<2x32xf32>
    %75 = arith.mulf %74, %20 : vector<2x32xf32>
    %76 = arith.addf %75, %23 : vector<2x32xf32>
    %cst_25 = arith.constant 0.000000e+00 : f32
    %77 = vector.broadcast %cst_25 : f32 to vector<2x32xf32>
    %78 = arith.maximumf %76, %77 : vector<2x32xf32>
    %79 = tpu.concatenate %36, %42, %48, %54, %60, %66, %72, %78 in 0 : vector<2x32xf32>, vector<2x32xf32>, vector<2x32xf32>, vector<2x32xf32>, vector<2x32xf32>, vector<2x32xf32>, vector<2x32xf32>, vector<2x32xf32> -> vector<16x32xf32>
    %cst_26 = arith.constant dense<0.000000e+00> : vector<16x128xf32>
    %80 = tpu.matmul %79, %24, %cst_26 {dimension_numbers = #tpu.dot_dimension_numbers<[1], [0], [0], [1], [0, 0, 1, 1], [], []>} : vector<16x32xf32>, vector<32x128xf32>, vector<16x128xf32> -> vector<16x128xf32>
    %81 = vector.broadcast %26 : vector<1x128xf32> to vector<16x128xf32>
    %82 = arith.addf %80, %81 : vector<16x128xf32>
    %cst_27 = arith.constant 0.000000e+00 : f32
    %83 = vector.broadcast %cst_27 : f32 to vector<2x32xf32>
    %84 = vector.extract_strided_slice %82 {offsets = [0, 0], sizes = [2, 128], strides = [1, 1]} : vector<16x128xf32> to vector<2x128xf32>
    %cst_28 = arith.constant dense<0.000000e+00> : vector<2x128xf32>
    %85 = tpu.matmul %83, %25, %cst_28 {dimension_numbers = #tpu.dot_dimension_numbers<[1], [0], [0], [1], [0, 0, 1, 1], [], []>} : vector<2x32xf32>, vector<32x128xf32>, vector<2x128xf32> -> vector<2x128xf32>
    %86 = arith.addf %84, %85 : vector<2x128xf32>
    %cst_29 = arith.constant 0.000000e+00 : f32
    %87 = vector.broadcast %cst_29 : f32 to vector<2x128xf32>
    %88 = arith.subf %87, %86 : vector<2x128xf32>
    %89 = math.exp %88 : vector<2x128xf32>
    %cst_30 = arith.constant 1.000000e+00 : f32
    %90 = vector.broadcast %cst_30 : f32 to vector<2x128xf32>
    %91 = arith.addf %90, %89 : vector<2x128xf32>
    %92 = tpu.reciprocal %91 {approx = true} : vector<2x128xf32> -> vector<2x128xf32>
    %93 = math.tanh %86 : vector<2x128xf32>
    %94 = vector.extract_strided_slice %92 {offsets = [0, 32], sizes = [2, 32], strides = [1, 1]} : vector<2x128xf32> to vector<2x32xf32>
    %95 = arith.mulf %94, %83 : vector<2x32xf32>
    %96 = vector.extract_strided_slice %92 {offsets = [0, 0], sizes = [2, 32], strides = [1, 1]} : vector<2x128xf32> to vector<2x32xf32>
    %97 = vector.extract_strided_slice %93 {offsets = [0, 64], sizes = [2, 32], strides = [1, 1]} : vector<2x128xf32> to vector<2x32xf32>
    %98 = arith.mulf %96, %97 : vector<2x32xf32>
    %99 = arith.addf %95, %98 : vector<2x32xf32>
    %100 = vector.extract_strided_slice %92 {offsets = [0, 96], sizes = [2, 32], strides = [1, 1]} : vector<2x128xf32> to vector<2x32xf32>
    %101 = math.tanh %99 : vector<2x32xf32>
    %102 = arith.mulf %100, %101 : vector<2x32xf32>
    %103 = tpu.concatenate %102, %83 in 1 : vector<2x32xf32>, vector<2x32xf32> -> vector<2x64xf32>
    %cst_31 = arith.constant dense<0.000000e+00> : vector<2x128xf32>
    %104 = tpu.matmul %103, %27, %cst_31 {dimension_numbers = #tpu.dot_dimension_numbers<[1], [0], [0], [1], [0, 0, 1, 1], [], []>} : vector<2x64xf32>, vector<64x128xf32>, vector<2x128xf32> -> vector<2x128xf32>
    %105 = arith.addf %104, %30 : vector<2x128xf32>
    %cst_32 = arith.constant 0.000000e+00 : f32
    %106 = vector.broadcast %cst_32 : f32 to vector<2x128xf32>
    %107 = arith.subf %106, %105 : vector<2x128xf32>
    %108 = math.exp %107 : vector<2x128xf32>
    %cst_33 = arith.constant 1.000000e+00 : f32
    %109 = vector.broadcast %cst_33 : f32 to vector<2x128xf32>
    %110 = arith.addf %109, %108 : vector<2x128xf32>
    %111 = tpu.reciprocal %110 {approx = true} : vector<2x128xf32> -> vector<2x128xf32>
    %112 = math.tanh %105 : vector<2x128xf32>
    %113 = vector.extract_strided_slice %111 {offsets = [0, 32], sizes = [2, 32], strides = [1, 1]} : vector<2x128xf32> to vector<2x32xf32>
    %114 = arith.mulf %113, %83 : vector<2x32xf32>
    %115 = vector.extract_strided_slice %111 {offsets = [0, 0], sizes = [2, 32], strides = [1, 1]} : vector<2x128xf32> to vector<2x32xf32>
    %116 = vector.extract_strided_slice %112 {offsets = [0, 64], sizes = [2, 32], strides = [1, 1]} : vector<2x128xf32> to vector<2x32xf32>
    %117 = arith.mulf %115, %116 : vector<2x32xf32>
    %118 = arith.addf %114, %117 : vector<2x32xf32>
    %119 = vector.extract_strided_slice %111 {offsets = [0, 96], sizes = [2, 32], strides = [1, 1]} : vector<2x128xf32> to vector<2x32xf32>
    %120 = math.tanh %118 : vector<2x32xf32>
    %121 = arith.mulf %119, %120 : vector<2x32xf32>
    %122 = vector.extract_strided_slice %82 {offsets = [2, 0], sizes = [2, 128], strides = [1, 1]} : vector<16x128xf32> to vector<2x128xf32>
    %cst_34 = arith.constant dense<0.000000e+00> : vector<2x128xf32>
    %123 = tpu.matmul %102, %25, %cst_34 {dimension_numbers = #tpu.dot_dimension_numbers<[1], [0], [0], [1], [0, 0, 1, 1], [], []>} : vector<2x32xf32>, vector<32x128xf32>, vector<2x128xf32> -> vector<2x128xf32>
    %124 = arith.addf %122, %123 : vector<2x128xf32>
    %cst_35 = arith.constant 0.000000e+00 : f32
    %125 = vector.broadcast %cst_35 : f32 to vector<2x128xf32>
    %126 = arith.subf %125, %124 : vector<2x128xf32>
    %127 = math.exp %126 : vector<2x128xf32>
    %cst_36 = arith.constant 1.000000e+00 : f32
    %128 = vector.broadcast %cst_36 : f32 to vector<2x128xf32>
    %129 = arith.addf %128, %127 : vector<2x128xf32>
    %130 = tpu.reciprocal %129 {approx = true} : vector<2x128xf32> -> vector<2x128xf32>
    %131 = math.tanh %124 : vector<2x128xf32>
    %132 = vector.extract_strided_slice %130 {offsets = [0, 32], sizes = [2, 32], strides = [1, 1]} : vector<2x128xf32> to vector<2x32xf32>
    %133 = arith.mulf %132, %99 : vector<2x32xf32>
    %134 = vector.extract_strided_slice %130 {offsets = [0, 0], sizes = [2, 32], strides = [1, 1]} : vector<2x128xf32> to vector<2x32xf32>
    %135 = vector.extract_strided_slice %131 {offsets = [0, 64], sizes = [2, 32], strides = [1, 1]} : vector<2x128xf32> to vector<2x32xf32>
    %136 = arith.mulf %134, %135 : vector<2x32xf32>
    %137 = arith.addf %133, %136 : vector<2x32xf32>
    %138 = vector.extract_strided_slice %130 {offsets = [0, 96], sizes = [2, 32], strides = [1, 1]} : vector<2x128xf32> to vector<2x32xf32>
    %139 = math.tanh %137 : vector<2x32xf32>
    %140 = arith.mulf %138, %139 : vector<2x32xf32>
    %141 = tpu.concatenate %140, %121 in 1 : vector<2x32xf32>, vector<2x32xf32> -> vector<2x64xf32>
    %cst_37 = arith.constant dense<0.000000e+00> : vector<2x128xf32>
    %142 = tpu.matmul %141, %27, %cst_37 {dimension_numbers = #tpu.dot_dimension_numbers<[1], [0], [0], [1], [0, 0, 1, 1], [], []>} : vector<2x64xf32>, vector<64x128xf32>, vector<2x128xf32> -> vector<2x128xf32>
    %143 = arith.addf %142, %30 : vector<2x128xf32>
    %cst_38 = arith.constant 0.000000e+00 : f32
    %144 = vector.broadcast %cst_38 : f32 to vector<2x128xf32>
    %145 = arith.subf %144, %143 : vector<2x128xf32>
    %146 = math.exp %145 : vector<2x128xf32>
    %cst_39 = arith.constant 1.000000e+00 : f32
    %147 = vector.broadcast %cst_39 : f32 to vector<2x128xf32>
    %148 = arith.addf %147, %146 : vector<2x128xf32>
    %149 = tpu.reciprocal %148 {approx = true} : vector<2x128xf32> -> vector<2x128xf32>
    %150 = math.tanh %143 : vector<2x128xf32>
    %151 = vector.extract_strided_slice %149 {offsets = [0, 32], sizes = [2, 32], strides = [1, 1]} : vector<2x128xf32> to vector<2x32xf32>
    %152 = arith.mulf %151, %118 : vector<2x32xf32>
    %153 = vector.extract_strided_slice %149 {offsets = [0, 0], sizes = [2, 32], strides = [1, 1]} : vector<2x128xf32> to vector<2x32xf32>
    %154 = vector.extract_strided_slice %150 {offsets = [0, 64], sizes = [2, 32], strides = [1, 1]} : vector<2x128xf32> to vector<2x32xf32>
    %155 = arith.mulf %153, %154 : vector<2x32xf32>
    %156 = arith.addf %152, %155 : vector<2x32xf32>
    %157 = vector.extract_strided_slice %149 {offsets = [0, 96], sizes = [2, 32], strides = [1, 1]} : vector<2x128xf32> to vector<2x32xf32>
    %158 = math.tanh %156 : vector<2x32xf32>
    %159 = arith.mulf %157, %158 : vector<2x32xf32>
    %160 = vector.extract_strided_slice %82 {offsets = [4, 0], sizes = [2, 128], strides = [1, 1]} : vector<16x128xf32> to vector<2x128xf32>
    %cst_40 = arith.constant dense<0.000000e+00> : vector<2x128xf32>
    %161 = tpu.matmul %140, %25, %cst_40 {dimension_numbers = #tpu.dot_dimension_numbers<[1], [0], [0], [1], [0, 0, 1, 1], [], []>} : vector<2x32xf32>, vector<32x128xf32>, vector<2x128xf32> -> vector<2x128xf32>
    %162 = arith.addf %160, %161 : vector<2x128xf32>
    %cst_41 = arith.constant 0.000000e+00 : f32
    %163 = vector.broadcast %cst_41 : f32 to vector<2x128xf32>
    %164 = arith.subf %163, %162 : vector<2x128xf32>
    %165 = math.exp %164 : vector<2x128xf32>
    %cst_42 = arith.constant 1.000000e+00 : f32
    %166 = vector.broadcast %cst_42 : f32 to vector<2x128xf32>
    %167 = arith.addf %166, %165 : vector<2x128xf32>
    %168 = tpu.reciprocal %167 {approx = true} : vector<2x128xf32> -> vector<2x128xf32>
    %169 = math.tanh %162 : vector<2x128xf32>
    %170 = vector.extract_strided_slice %168 {offsets = [0, 32], sizes = [2, 32], strides = [1, 1]} : vector<2x128xf32> to vector<2x32xf32>
    %171 = arith.mulf %170, %137 : vector<2x32xf32>
    %172 = vector.extract_strided_slice %168 {offsets = [0, 0], sizes = [2, 32], strides = [1, 1]} : vector<2x128xf32> to vector<2x32xf32>
    %173 = vector.extract_strided_slice %169 {offsets = [0, 64], sizes = [2, 32], strides = [1, 1]} : vector<2x128xf32> to vector<2x32xf32>
    %174 = arith.mulf %172, %173 : vector<2x32xf32>
    %175 = arith.addf %171, %174 : vector<2x32xf32>
    %176 = vector.extract_strided_slice %168 {offsets = [0, 96], sizes = [2, 32], strides = [1, 1]} : vector<2x128xf32> to vector<2x32xf32>
    %177 = math.tanh %175 : vector<2x32xf32>
    %178 = arith.mulf %176, %177 : vector<2x32xf32>
    %179 = tpu.concatenate %178, %159 in 1 : vector<2x32xf32>, vector<2x32xf32> -> vector<2x64xf32>
    %cst_43 = arith.constant dense<0.000000e+00> : vector<2x128xf32>
    %180 = tpu.matmul %179, %27, %cst_43 {dimension_numbers = #tpu.dot_dimension_numbers<[1], [0], [0], [1], [0, 0, 1, 1], [], []>} : vector<2x64xf32>, vector<64x128xf32>, vector<2x128xf32> -> vector<2x128xf32>
    %181 = arith.addf %180, %30 : vector<2x128xf32>
    %cst_44 = arith.constant 0.000000e+00 : f32
    %182 = vector.broadcast %cst_44 : f32 to vector<2x128xf32>
    %183 = arith.subf %182, %181 : vector<2x128xf32>
    %184 = math.exp %183 : vector<2x128xf32>
    %cst_45 = arith.constant 1.000000e+00 : f32
    %185 = vector.broadcast %cst_45 : f32 to vector<2x128xf32>
    %186 = arith.addf %185, %184 : vector<2x128xf32>
    %187 = tpu.reciprocal %186 {approx = true} : vector<2x128xf32> -> vector<2x128xf32>
    %188 = math.tanh %181 : vector<2x128xf32>
    %189 = vector.extract_strided_slice %187 {offsets = [0, 32], sizes = [2, 32], strides = [1, 1]} : vector<2x128xf32> to vector<2x32xf32>
    %190 = arith.mulf %189, %156 : vector<2x32xf32>
    %191 = vector.extract_strided_slice %187 {offsets = [0, 0], sizes = [2, 32], strides = [1, 1]} : vector<2x128xf32> to vector<2x32xf32>
    %192 = vector.extract_strided_slice %188 {offsets = [0, 64], sizes = [2, 32], strides = [1, 1]} : vector<2x128xf32> to vector<2x32xf32>
    %193 = arith.mulf %191, %192 : vector<2x32xf32>
    %194 = arith.addf %190, %193 : vector<2x32xf32>
    %195 = vector.extract_strided_slice %187 {offsets = [0, 96], sizes = [2, 32], strides = [1, 1]} : vector<2x128xf32> to vector<2x32xf32>
    %196 = math.tanh %194 : vector<2x32xf32>
    %197 = arith.mulf %195, %196 : vector<2x32xf32>
    %198 = vector.extract_strided_slice %82 {offsets = [6, 0], sizes = [2, 128], strides = [1, 1]} : vector<16x128xf32> to vector<2x128xf32>
    %cst_46 = arith.constant dense<0.000000e+00> : vector<2x128xf32>
    %199 = tpu.matmul %178, %25, %cst_46 {dimension_numbers = #tpu.dot_dimension_numbers<[1], [0], [0], [1], [0, 0, 1, 1], [], []>} : vector<2x32xf32>, vector<32x128xf32>, vector<2x128xf32> -> vector<2x128xf32>
    %200 = arith.addf %198, %199 : vector<2x128xf32>
    %cst_47 = arith.constant 0.000000e+00 : f32
    %201 = vector.broadcast %cst_47 : f32 to vector<2x128xf32>
    %202 = arith.subf %201, %200 : vector<2x128xf32>
    %203 = math.exp %202 : vector<2x128xf32>
    %cst_48 = arith.constant 1.000000e+00 : f32
    %204 = vector.broadcast %cst_48 : f32 to vector<2x128xf32>
    %205 = arith.addf %204, %203 : vector<2x128xf32>
    %206 = tpu.reciprocal %205 {approx = true} : vector<2x128xf32> -> vector<2x128xf32>
    %207 = math.tanh %200 : vector<2x128xf32>
    %208 = vector.extract_strided_slice %206 {offsets = [0, 32], sizes = [2, 32], strides = [1, 1]} : vector<2x128xf32> to vector<2x32xf32>
    %209 = arith.mulf %208, %175 : vector<2x32xf32>
    %210 = vector.extract_strided_slice %206 {offsets = [0, 0], sizes = [2, 32], strides = [1, 1]} : vector<2x128xf32> to vector<2x32xf32>
    %211 = vector.extract_strided_slice %207 {offsets = [0, 64], sizes = [2, 32], strides = [1, 1]} : vector<2x128xf32> to vector<2x32xf32>
    %212 = arith.mulf %210, %211 : vector<2x32xf32>
    %213 = arith.addf %209, %212 : vector<2x32xf32>
    %214 = vector.extract_strided_slice %206 {offsets = [0, 96], sizes = [2, 32], strides = [1, 1]} : vector<2x128xf32> to vector<2x32xf32>
    %215 = math.tanh %213 : vector<2x32xf32>
    %216 = arith.mulf %214, %215 : vector<2x32xf32>
    %217 = tpu.concatenate %216, %197 in 1 : vector<2x32xf32>, vector<2x32xf32> -> vector<2x64xf32>
    %cst_49 = arith.constant dense<0.000000e+00> : vector<2x128xf32>
    %218 = tpu.matmul %217, %27, %cst_49 {dimension_numbers = #tpu.dot_dimension_numbers<[1], [0], [0], [1], [0, 0, 1, 1], [], []>} : vector<2x64xf32>, vector<64x128xf32>, vector<2x128xf32> -> vector<2x128xf32>
    %219 = arith.addf %218, %30 : vector<2x128xf32>
    %cst_50 = arith.constant 0.000000e+00 : f32
    %220 = vector.broadcast %cst_50 : f32 to vector<2x128xf32>
    %221 = arith.subf %220, %219 : vector<2x128xf32>
    %222 = math.exp %221 : vector<2x128xf32>
    %cst_51 = arith.constant 1.000000e+00 : f32
    %223 = vector.broadcast %cst_51 : f32 to vector<2x128xf32>
    %224 = arith.addf %223, %222 : vector<2x128xf32>
    %225 = tpu.reciprocal %224 {approx = true} : vector<2x128xf32> -> vector<2x128xf32>
    %226 = math.tanh %219 : vector<2x128xf32>
    %227 = vector.extract_strided_slice %225 {offsets = [0, 32], sizes = [2, 32], strides = [1, 1]} : vector<2x128xf32> to vector<2x32xf32>
    %228 = arith.mulf %227, %194 : vector<2x32xf32>
    %229 = vector.extract_strided_slice %225 {offsets = [0, 0], sizes = [2, 32], strides = [1, 1]} : vector<2x128xf32> to vector<2x32xf32>
    %230 = vector.extract_strided_slice %226 {offsets = [0, 64], sizes = [2, 32], strides = [1, 1]} : vector<2x128xf32> to vector<2x32xf32>
    %231 = arith.mulf %229, %230 : vector<2x32xf32>
    %232 = arith.addf %228, %231 : vector<2x32xf32>
    %233 = vector.extract_strided_slice %225 {offsets = [0, 96], sizes = [2, 32], strides = [1, 1]} : vector<2x128xf32> to vector<2x32xf32>
    %234 = math.tanh %232 : vector<2x32xf32>
    %235 = arith.mulf %233, %234 : vector<2x32xf32>
    %236 = vector.extract_strided_slice %82 {offsets = [8, 0], sizes = [2, 128], strides = [1, 1]} : vector<16x128xf32> to vector<2x128xf32>
    %cst_52 = arith.constant dense<0.000000e+00> : vector<2x128xf32>
    %237 = tpu.matmul %216, %25, %cst_52 {dimension_numbers = #tpu.dot_dimension_numbers<[1], [0], [0], [1], [0, 0, 1, 1], [], []>} : vector<2x32xf32>, vector<32x128xf32>, vector<2x128xf32> -> vector<2x128xf32>
    %238 = arith.addf %236, %237 : vector<2x128xf32>
    %cst_53 = arith.constant 0.000000e+00 : f32
    %239 = vector.broadcast %cst_53 : f32 to vector<2x128xf32>
    %240 = arith.subf %239, %238 : vector<2x128xf32>
    %241 = math.exp %240 : vector<2x128xf32>
    %cst_54 = arith.constant 1.000000e+00 : f32
    %242 = vector.broadcast %cst_54 : f32 to vector<2x128xf32>
    %243 = arith.addf %242, %241 : vector<2x128xf32>
    %244 = tpu.reciprocal %243 {approx = true} : vector<2x128xf32> -> vector<2x128xf32>
    %245 = math.tanh %238 : vector<2x128xf32>
    %246 = vector.extract_strided_slice %244 {offsets = [0, 32], sizes = [2, 32], strides = [1, 1]} : vector<2x128xf32> to vector<2x32xf32>
    %247 = arith.mulf %246, %213 : vector<2x32xf32>
    %248 = vector.extract_strided_slice %244 {offsets = [0, 0], sizes = [2, 32], strides = [1, 1]} : vector<2x128xf32> to vector<2x32xf32>
    %249 = vector.extract_strided_slice %245 {offsets = [0, 64], sizes = [2, 32], strides = [1, 1]} : vector<2x128xf32> to vector<2x32xf32>
    %250 = arith.mulf %248, %249 : vector<2x32xf32>
    %251 = arith.addf %247, %250 : vector<2x32xf32>
    %252 = vector.extract_strided_slice %244 {offsets = [0, 96], sizes = [2, 32], strides = [1, 1]} : vector<2x128xf32> to vector<2x32xf32>
    %253 = math.tanh %251 : vector<2x32xf32>
    %254 = arith.mulf %252, %253 : vector<2x32xf32>
    %255 = tpu.concatenate %254, %235 in 1 : vector<2x32xf32>, vector<2x32xf32> -> vector<2x64xf32>
    %cst_55 = arith.constant dense<0.000000e+00> : vector<2x128xf32>
    %256 = tpu.matmul %255, %27, %cst_55 {dimension_numbers = #tpu.dot_dimension_numbers<[1], [0], [0], [1], [0, 0, 1, 1], [], []>} : vector<2x64xf32>, vector<64x128xf32>, vector<2x128xf32> -> vector<2x128xf32>
    %257 = arith.addf %256, %30 : vector<2x128xf32>
    %cst_56 = arith.constant 0.000000e+00 : f32
    %258 = vector.broadcast %cst_56 : f32 to vector<2x128xf32>
    %259 = arith.subf %258, %257 : vector<2x128xf32>
    %260 = math.exp %259 : vector<2x128xf32>
    %cst_57 = arith.constant 1.000000e+00 : f32
    %261 = vector.broadcast %cst_57 : f32 to vector<2x128xf32>
    %262 = arith.addf %261, %260 : vector<2x128xf32>
    %263 = tpu.reciprocal %262 {approx = true} : vector<2x128xf32> -> vector<2x128xf32>
    %264 = math.tanh %257 : vector<2x128xf32>
    %265 = vector.extract_strided_slice %263 {offsets = [0, 32], sizes = [2, 32], strides = [1, 1]} : vector<2x128xf32> to vector<2x32xf32>
    %266 = arith.mulf %265, %232 : vector<2x32xf32>
    %267 = vector.extract_strided_slice %263 {offsets = [0, 0], sizes = [2, 32], strides = [1, 1]} : vector<2x128xf32> to vector<2x32xf32>
    %268 = vector.extract_strided_slice %264 {offsets = [0, 64], sizes = [2, 32], strides = [1, 1]} : vector<2x128xf32> to vector<2x32xf32>
    %269 = arith.mulf %267, %268 : vector<2x32xf32>
    %270 = arith.addf %266, %269 : vector<2x32xf32>
    %271 = vector.extract_strided_slice %263 {offsets = [0, 96], sizes = [2, 32], strides = [1, 1]} : vector<2x128xf32> to vector<2x32xf32>
    %272 = math.tanh %270 : vector<2x32xf32>
    %273 = arith.mulf %271, %272 : vector<2x32xf32>
    %274 = vector.extract_strided_slice %82 {offsets = [10, 0], sizes = [2, 128], strides = [1, 1]} : vector<16x128xf32> to vector<2x128xf32>
    %cst_58 = arith.constant dense<0.000000e+00> : vector<2x128xf32>
    %275 = tpu.matmul %254, %25, %cst_58 {dimension_numbers = #tpu.dot_dimension_numbers<[1], [0], [0], [1], [0, 0, 1, 1], [], []>} : vector<2x32xf32>, vector<32x128xf32>, vector<2x128xf32> -> vector<2x128xf32>
    %276 = arith.addf %274, %275 : vector<2x128xf32>
    %cst_59 = arith.constant 0.000000e+00 : f32
    %277 = vector.broadcast %cst_59 : f32 to vector<2x128xf32>
    %278 = arith.subf %277, %276 : vector<2x128xf32>
    %279 = math.exp %278 : vector<2x128xf32>
    %cst_60 = arith.constant 1.000000e+00 : f32
    %280 = vector.broadcast %cst_60 : f32 to vector<2x128xf32>
    %281 = arith.addf %280, %279 : vector<2x128xf32>
    %282 = tpu.reciprocal %281 {approx = true} : vector<2x128xf32> -> vector<2x128xf32>
    %283 = math.tanh %276 : vector<2x128xf32>
    %284 = vector.extract_strided_slice %282 {offsets = [0, 32], sizes = [2, 32], strides = [1, 1]} : vector<2x128xf32> to vector<2x32xf32>
    %285 = arith.mulf %284, %251 : vector<2x32xf32>
    %286 = vector.extract_strided_slice %282 {offsets = [0, 0], sizes = [2, 32], strides = [1, 1]} : vector<2x128xf32> to vector<2x32xf32>
    %287 = vector.extract_strided_slice %283 {offsets = [0, 64], sizes = [2, 32], strides = [1, 1]} : vector<2x128xf32> to vector<2x32xf32>
    %288 = arith.mulf %286, %287 : vector<2x32xf32>
    %289 = arith.addf %285, %288 : vector<2x32xf32>
    %290 = vector.extract_strided_slice %282 {offsets = [0, 96], sizes = [2, 32], strides = [1, 1]} : vector<2x128xf32> to vector<2x32xf32>
    %291 = math.tanh %289 : vector<2x32xf32>
    %292 = arith.mulf %290, %291 : vector<2x32xf32>
    %293 = tpu.concatenate %292, %273 in 1 : vector<2x32xf32>, vector<2x32xf32> -> vector<2x64xf32>
    %cst_61 = arith.constant dense<0.000000e+00> : vector<2x128xf32>
    %294 = tpu.matmul %293, %27, %cst_61 {dimension_numbers = #tpu.dot_dimension_numbers<[1], [0], [0], [1], [0, 0, 1, 1], [], []>} : vector<2x64xf32>, vector<64x128xf32>, vector<2x128xf32> -> vector<2x128xf32>
    %295 = arith.addf %294, %30 : vector<2x128xf32>
    %cst_62 = arith.constant 0.000000e+00 : f32
    %296 = vector.broadcast %cst_62 : f32 to vector<2x128xf32>
    %297 = arith.subf %296, %295 : vector<2x128xf32>
    %298 = math.exp %297 : vector<2x128xf32>
    %cst_63 = arith.constant 1.000000e+00 : f32
    %299 = vector.broadcast %cst_63 : f32 to vector<2x128xf32>
    %300 = arith.addf %299, %298 : vector<2x128xf32>
    %301 = tpu.reciprocal %300 {approx = true} : vector<2x128xf32> -> vector<2x128xf32>
    %302 = math.tanh %295 : vector<2x128xf32>
    %303 = vector.extract_strided_slice %301 {offsets = [0, 32], sizes = [2, 32], strides = [1, 1]} : vector<2x128xf32> to vector<2x32xf32>
    %304 = arith.mulf %303, %270 : vector<2x32xf32>
    %305 = vector.extract_strided_slice %301 {offsets = [0, 0], sizes = [2, 32], strides = [1, 1]} : vector<2x128xf32> to vector<2x32xf32>
    %306 = vector.extract_strided_slice %302 {offsets = [0, 64], sizes = [2, 32], strides = [1, 1]} : vector<2x128xf32> to vector<2x32xf32>
    %307 = arith.mulf %305, %306 : vector<2x32xf32>
    %308 = arith.addf %304, %307 : vector<2x32xf32>
    %309 = vector.extract_strided_slice %301 {offsets = [0, 96], sizes = [2, 32], strides = [1, 1]} : vector<2x128xf32> to vector<2x32xf32>
    %310 = math.tanh %308 : vector<2x32xf32>
    %311 = arith.mulf %309, %310 : vector<2x32xf32>
    %312 = vector.extract_strided_slice %82 {offsets = [12, 0], sizes = [2, 128], strides = [1, 1]} : vector<16x128xf32> to vector<2x128xf32>
    %cst_64 = arith.constant dense<0.000000e+00> : vector<2x128xf32>
    %313 = tpu.matmul %292, %25, %cst_64 {dimension_numbers = #tpu.dot_dimension_numbers<[1], [0], [0], [1], [0, 0, 1, 1], [], []>} : vector<2x32xf32>, vector<32x128xf32>, vector<2x128xf32> -> vector<2x128xf32>
    %314 = arith.addf %312, %313 : vector<2x128xf32>
    %cst_65 = arith.constant 0.000000e+00 : f32
    %315 = vector.broadcast %cst_65 : f32 to vector<2x128xf32>
    %316 = arith.subf %315, %314 : vector<2x128xf32>
    %317 = math.exp %316 : vector<2x128xf32>
    %cst_66 = arith.constant 1.000000e+00 : f32
    %318 = vector.broadcast %cst_66 : f32 to vector<2x128xf32>
    %319 = arith.addf %318, %317 : vector<2x128xf32>
    %320 = tpu.reciprocal %319 {approx = true} : vector<2x128xf32> -> vector<2x128xf32>
    %321 = math.tanh %314 : vector<2x128xf32>
    %322 = vector.extract_strided_slice %320 {offsets = [0, 32], sizes = [2, 32], strides = [1, 1]} : vector<2x128xf32> to vector<2x32xf32>
    %323 = arith.mulf %322, %289 : vector<2x32xf32>
    %324 = vector.extract_strided_slice %320 {offsets = [0, 0], sizes = [2, 32], strides = [1, 1]} : vector<2x128xf32> to vector<2x32xf32>
    %325 = vector.extract_strided_slice %321 {offsets = [0, 64], sizes = [2, 32], strides = [1, 1]} : vector<2x128xf32> to vector<2x32xf32>
    %326 = arith.mulf %324, %325 : vector<2x32xf32>
    %327 = arith.addf %323, %326 : vector<2x32xf32>
    %328 = vector.extract_strided_slice %320 {offsets = [0, 96], sizes = [2, 32], strides = [1, 1]} : vector<2x128xf32> to vector<2x32xf32>
    %329 = math.tanh %327 : vector<2x32xf32>
    %330 = arith.mulf %328, %329 : vector<2x32xf32>
    %331 = tpu.concatenate %330, %311 in 1 : vector<2x32xf32>, vector<2x32xf32> -> vector<2x64xf32>
    %cst_67 = arith.constant dense<0.000000e+00> : vector<2x128xf32>
    %332 = tpu.matmul %331, %27, %cst_67 {dimension_numbers = #tpu.dot_dimension_numbers<[1], [0], [0], [1], [0, 0, 1, 1], [], []>} : vector<2x64xf32>, vector<64x128xf32>, vector<2x128xf32> -> vector<2x128xf32>
    %333 = arith.addf %332, %30 : vector<2x128xf32>
    %cst_68 = arith.constant 0.000000e+00 : f32
    %334 = vector.broadcast %cst_68 : f32 to vector<2x128xf32>
    %335 = arith.subf %334, %333 : vector<2x128xf32>
    %336 = math.exp %335 : vector<2x128xf32>
    %cst_69 = arith.constant 1.000000e+00 : f32
    %337 = vector.broadcast %cst_69 : f32 to vector<2x128xf32>
    %338 = arith.addf %337, %336 : vector<2x128xf32>
    %339 = tpu.reciprocal %338 {approx = true} : vector<2x128xf32> -> vector<2x128xf32>
    %340 = math.tanh %333 : vector<2x128xf32>
    %341 = vector.extract_strided_slice %339 {offsets = [0, 32], sizes = [2, 32], strides = [1, 1]} : vector<2x128xf32> to vector<2x32xf32>
    %342 = arith.mulf %341, %308 : vector<2x32xf32>
    %343 = vector.extract_strided_slice %339 {offsets = [0, 0], sizes = [2, 32], strides = [1, 1]} : vector<2x128xf32> to vector<2x32xf32>
    %344 = vector.extract_strided_slice %340 {offsets = [0, 64], sizes = [2, 32], strides = [1, 1]} : vector<2x128xf32> to vector<2x32xf32>
    %345 = arith.mulf %343, %344 : vector<2x32xf32>
    %346 = arith.addf %342, %345 : vector<2x32xf32>
    %347 = vector.extract_strided_slice %339 {offsets = [0, 96], sizes = [2, 32], strides = [1, 1]} : vector<2x128xf32> to vector<2x32xf32>
    %348 = math.tanh %346 : vector<2x32xf32>
    %349 = arith.mulf %347, %348 : vector<2x32xf32>
    %350 = vector.extract_strided_slice %82 {offsets = [14, 0], sizes = [2, 128], strides = [1, 1]} : vector<16x128xf32> to vector<2x128xf32>
    %cst_70 = arith.constant dense<0.000000e+00> : vector<2x128xf32>
    %351 = tpu.matmul %330, %25, %cst_70 {dimension_numbers = #tpu.dot_dimension_numbers<[1], [0], [0], [1], [0, 0, 1, 1], [], []>} : vector<2x32xf32>, vector<32x128xf32>, vector<2x128xf32> -> vector<2x128xf32>
    %352 = arith.addf %350, %351 : vector<2x128xf32>
    %cst_71 = arith.constant 0.000000e+00 : f32
    %353 = vector.broadcast %cst_71 : f32 to vector<2x128xf32>
    %354 = arith.subf %353, %352 : vector<2x128xf32>
    %355 = math.exp %354 : vector<2x128xf32>
    %cst_72 = arith.constant 1.000000e+00 : f32
    %356 = vector.broadcast %cst_72 : f32 to vector<2x128xf32>
    %357 = arith.addf %356, %355 : vector<2x128xf32>
    %358 = tpu.reciprocal %357 {approx = true} : vector<2x128xf32> -> vector<2x128xf32>
    %359 = math.tanh %352 : vector<2x128xf32>
    %360 = vector.extract_strided_slice %358 {offsets = [0, 32], sizes = [2, 32], strides = [1, 1]} : vector<2x128xf32> to vector<2x32xf32>
    %361 = arith.mulf %360, %327 : vector<2x32xf32>
    %362 = vector.extract_strided_slice %358 {offsets = [0, 0], sizes = [2, 32], strides = [1, 1]} : vector<2x128xf32> to vector<2x32xf32>
    %363 = vector.extract_strided_slice %359 {offsets = [0, 64], sizes = [2, 32], strides = [1, 1]} : vector<2x128xf32> to vector<2x32xf32>
    %364 = arith.mulf %362, %363 : vector<2x32xf32>
    %365 = arith.addf %361, %364 : vector<2x32xf32>
    %366 = vector.extract_strided_slice %358 {offsets = [0, 96], sizes = [2, 32], strides = [1, 1]} : vector<2x128xf32> to vector<2x32xf32>
    %367 = math.tanh %365 : vector<2x32xf32>
    %368 = arith.mulf %366, %367 : vector<2x32xf32>
    %369 = tpu.concatenate %368, %349 in 1 : vector<2x32xf32>, vector<2x32xf32> -> vector<2x64xf32>
    %cst_73 = arith.constant dense<0.000000e+00> : vector<2x128xf32>
    %370 = tpu.matmul %369, %27, %cst_73 {dimension_numbers = #tpu.dot_dimension_numbers<[1], [0], [0], [1], [0, 0, 1, 1], [], []>} : vector<2x64xf32>, vector<64x128xf32>, vector<2x128xf32> -> vector<2x128xf32>
    %371 = arith.addf %370, %30 : vector<2x128xf32>
    %cst_74 = arith.constant 0.000000e+00 : f32
    %372 = vector.broadcast %cst_74 : f32 to vector<2x128xf32>
    %373 = arith.subf %372, %371 : vector<2x128xf32>
    %374 = math.exp %373 : vector<2x128xf32>
    %cst_75 = arith.constant 1.000000e+00 : f32
    %375 = vector.broadcast %cst_75 : f32 to vector<2x128xf32>
    %376 = arith.addf %375, %374 : vector<2x128xf32>
    %377 = tpu.reciprocal %376 {approx = true} : vector<2x128xf32> -> vector<2x128xf32>
    %378 = math.tanh %371 : vector<2x128xf32>
    %379 = vector.extract_strided_slice %377 {offsets = [0, 32], sizes = [2, 32], strides = [1, 1]} : vector<2x128xf32> to vector<2x32xf32>
    %380 = arith.mulf %379, %346 : vector<2x32xf32>
    %381 = vector.extract_strided_slice %377 {offsets = [0, 0], sizes = [2, 32], strides = [1, 1]} : vector<2x128xf32> to vector<2x32xf32>
    %382 = vector.extract_strided_slice %378 {offsets = [0, 64], sizes = [2, 32], strides = [1, 1]} : vector<2x128xf32> to vector<2x32xf32>
    %383 = arith.mulf %381, %382 : vector<2x32xf32>
    %384 = arith.addf %380, %383 : vector<2x32xf32>
    %385 = vector.extract_strided_slice %377 {offsets = [0, 96], sizes = [2, 32], strides = [1, 1]} : vector<2x128xf32> to vector<2x32xf32>
    %386 = math.tanh %384 : vector<2x32xf32>
    %387 = arith.mulf %385, %386 : vector<2x32xf32>
    %388 = tpu.concatenate %368, %387 in 1 : vector<2x32xf32>, vector<2x32xf32> -> vector<2x64xf32>
    %c0_76 = arith.constant 0 : index
    %c0_77 = arith.constant 0 : index
    %389 = vector.load %arg9[%c0_76, %c0_77] : memref<1x64xf32, #tpu.memory_space<vmem>>, vector<1x64xf32>
    %390 = vector.broadcast %389 : vector<1x64xf32> to vector<2x64xf32>
    %391 = arith.mulf %388, %390 : vector<2x64xf32>
    %cst_78 = arith.constant dense<0.000000e+00> : vector<2xf32>
    %392 = vector.multi_reduction <add>, %391, %cst_78 [1] : vector<2x64xf32> to vector<2xf32>
    %393 = vector.shape_cast %392 : vector<2xf32> to vector<2x1xf32>
    %c0_79 = arith.constant 0 : index
    %c0_80 = arith.constant 0 : index
    %394 = vector.load %arg10[%c0_79, %c0_80] : memref<1x1xf32, #tpu.memory_space<vmem>>, vector<1x1xf32>
    %395 = vector.broadcast %394 : vector<1x1xf32> to vector<2x1xf32>
    %396 = arith.addf %393, %395 : vector<2x1xf32>
    %397 = arith.mulf %396, %13 : vector<2x1xf32>
    %398 = arith.addf %397, %4 : vector<2x1xf32>
    %c0_81 = arith.constant 0 : index
    %c0_82 = arith.constant 0 : index
    %399 = vector.load %arg11[%c0_81, %c0_82] : memref<2x1xf32, #tpu.memory_space<vmem>>, vector<2x1xf32>
    tpu.vector_store %arg11[%c0_81, %c0_82], %398 {strides = array<i32>} : memref<2x1xf32, #tpu.memory_space<vmem>>, vector<2x1xf32>,
    return
  }
  func.func @transform_0(%arg0: i32) -> (i32, i32) {
    %c0_i32 = arith.constant 0 : i32
    %c0_i32_0 = arith.constant 0 : i32
    %c0_i32_1 = arith.constant 0 : i32
    return %c0_i32, %c0_i32_0 : i32, i32
  }
  func.func @transform_1(%arg0: i32) -> (i32, i32) {
    %c0_i32 = arith.constant 0 : i32
    %c0_i32_0 = arith.constant 0 : i32
    %c0_i32_1 = arith.constant 0 : i32
    return %c0_i32, %c0_i32_0 : i32, i32
  }
  func.func @transform_2(%arg0: i32) -> (i32, i32) {
    %c0_i32 = arith.constant 0 : i32
    %c0_i32_0 = arith.constant 0 : i32
    %c0_i32_1 = arith.constant 0 : i32
    return %c0_i32, %c0_i32_0 : i32, i32
  }
  func.func @transform_3(%arg0: i32) -> (i32, i32) {
    %c0_i32 = arith.constant 0 : i32
    %c0_i32_0 = arith.constant 0 : i32
    %c0_i32_1 = arith.constant 0 : i32
    return %c0_i32, %c0_i32_0 : i32, i32
  }
  func.func @transform_4(%arg0: i32) -> (i32, i32) {
    %c0_i32 = arith.constant 0 : i32
    %c0_i32_0 = arith.constant 0 : i32
    %c0_i32_1 = arith.constant 0 : i32
    return %c0_i32, %c0_i32_0 : i32, i32
  }
  func.func @transform_5(%arg0: i32) -> (i32, i32) {
    %c0_i32 = arith.constant 0 : i32
    %c0_i32_0 = arith.constant 0 : i32
    %c0_i32_1 = arith.constant 0 : i32
    return %c0_i32, %c0_i32_0 : i32, i32
  }
  func.func @transform_6(%arg0: i32) -> (i32, i32) {
    %c0_i32 = arith.constant 0 : i32
    %c0_i32_0 = arith.constant 0 : i32
    %c0_i32_1 = arith.constant 0 : i32
    return %c0_i32, %c0_i32_0 : i32, i32
  }
  func.func @transform_7(%arg0: i32) -> (i32, i32) {
    %c0_i32 = arith.constant 0 : i32
    %c0_i32_0 = arith.constant 0 : i32
    %c0_i32_1 = arith.constant 0 : i32
    return %c0_i32, %c0_i32_0 : i32, i32
  }
  func.func @transform_8(%arg0: i32) -> (i32, i32) {
    %c0_i32 = arith.constant 0 : i32
    %c0_i32_0 = arith.constant 0 : i32
    %c0_i32_1 = arith.constant 0 : i32
    return %c0_i32, %c0_i32_0 : i32, i32
  }
  func.func @transform_9(%arg0: i32) -> (i32, i32) {
    %c0_i32 = arith.constant 0 : i32
    %c0_i32_0 = arith.constant 0 : i32
    %c0_i32_1 = arith.constant 0 : i32
    return %c0_i32, %c0_i32_0 : i32, i32
  }
  func.func @transform_10(%arg0: i32) -> (i32, i32) {
    %c0_i32 = arith.constant 0 : i32
    %c0_i32_0 = arith.constant 0 : i32
    %c0_i32_1 = arith.constant 0 : i32
    return %c0_i32, %c0_i32_0 : i32, i32
  }
}

</mosaic_0001>

<bundles_post_ra>
// kernel: tpu_custom_call.1
= control target key start
LH: loop header
LB: loop body
LE: loop exit
PB: predicated region body
PF: predicated region fallthrough
CT: control target
= control target key end

     0   :  { %s1909_s0 = inlined_call_operand.hbm [shape: f32[2,8], index: 0, kind: input, shape index: {}]   ;;  %s1910_s1 = inlined_call_operand.vmem [shape: f32[1,32], index: 1, kind: input, shape index: {}]   ;;  %s1911_s2 = inlined_call_operand.vmem [shape: f32[1,32], index: 2, kind: input, shape index: {}]   ;;  %s1912_s3 = inlined_call_operand.hbm [shape: f32[32,128], index: 3, kind: input, shape index: {}]   ;;  %s1913_s4 = inlined_call_operand.hbm [shape: f32[32,128], index: 4, kind: input, shape index: {}]   ;;  %s1914_s5 = inlined_call_operand.vmem [shape: f32[1,128], index: 5, kind: input, shape index: {}]   ;;  %s1915_s6 = inlined_call_operand.hbm [shape: f32[64,128], index: 6, kind: input, shape index: {}]   ;;  %s1916_s7 = inlined_call_operand.vmem [shape: f32[1,128], index: 7, kind: input, shape index: {}]   ;;  %s1917_s8 = inlined_call_operand.vmem [shape: f32[1,64], index: 8, kind: input, shape index: {}]   ;;  %s1918_s9 = inlined_call_operand.<no memory space> [shape: f32[1,1], index: 9, kind: input, shape index: {}]   ;;  %s1919_s10 = inlined_call_operand.vmem [shape: f32[2,1], index: 10, kind: output, shape index: {}]  }
   0x1   :  { %v15_v0 = vstv %s1918_s9 }
   0x2   :  { %16 = vst [vmem:[#allocation3] sm:$0x1] %v15_v0 }
   0x3   :  { %17 = vsyncpa [#allocation5], 0 }
   0x4   :  { %18 = vsyncpa [#allocation7], 0  ;;  %s39_s17 = sshll.u32 %s1912_s3, 4  ;;  %s40_s17 = int_to_ptr.hbm [resolvable:$true] %s39_s17 }
   0x5   :  { %19 = vsyncpa [#allocation10], 0  ;;  %s1489_s18 = smov [#allocation6]   ;;  %s25_s22 = sshll.u32 %s1909_s0, 4  ;;  %s26_s22 = int_to_ptr.hbm [resolvable:$true] %s25_s22 }
   0x6   :  { %s41_s19 = sshll.u32 %s1489_s18, 4  ;;  %s1490_s23 = smov 128   ;;  %s42_s19 = int_to_ptr.vmem [resolvable:$true] %s41_s19 }
   0x7   :  { %s1491_s24 = smov 8   ;;  %s1492_s9 = smov [#allocation4]  }
   0x8   :  { %47 = dma.hbm_to_vmem [thread:$0]  %s40_s17, 512, %s42_s19, [#allocation7], %s1490_s23, %s1490_s23, %s1491_s24  }
   0x9   :  { %s27_s25 = sshll.u32 %s1492_s9, 4  ;;  %s52_s28 = sshll.u32 %s1913_s4, 4  ;;  %s28_s25 = int_to_ptr.vmem [resolvable:$true] %s27_s25  ;;  %s53_s28 = int_to_ptr.hbm [resolvable:$true] %s52_s28 }
   0xa   :  { %30 = dma.hbm_to_vmem [thread:$0]  %s26_s22, 32, %s28_s25, [#allocation5]  }
   0xb   :  { %s67_s30 = sshll.u32 %s1915_s6, 4  ;;  %s1493_s11 = smov [#allocation8]   ;;  %s68_s30 = int_to_ptr.hbm [resolvable:$true] %s67_s30 }
   0xc   :  { %s54_s12 = sshll.u32 %s1493_s11, 4  ;;  %s1494_s0 = smov [#allocation9]   ;;  %s55_s12 = int_to_ptr.vmem [resolvable:$true] %s54_s12 }
   0xd   :  { %60 = dma.hbm_to_vmem [thread:$0]  %s53_s28, 512, %s55_s12, [#allocation7], %s1490_s23, %s1490_s23, %s1491_s24  }
   0xe   :  { %s69_s13 = sshll.u32 %s1494_s0, 4  ;;  %s70_s13 = int_to_ptr.vmem [resolvable:$true] %s69_s13 }
   0xf   :  { %75 = dma.hbm_to_vmem [thread:$0]  %s68_s30, 1024, %s70_s13, [#allocation10], %s1490_s23, %s1490_s23, %s1491_s24  }
  0x10   :  { %1483 = dma.done.wait [#allocation5], 32  }
  0x11   :  { %1484 = vsyncadd [#allocation5], 4294967264 }
  0x12   :  { %1485 = dma.done.wait [#allocation7], 1024  }
  0x13   :  { %1486 = vsyncadd [#allocation7], 4294966272 }
  0x14   :  { %1487 = dma.done.wait [#allocation10], 1024  }
  0x15   :  { %1488 = vsyncadd [#allocation10], 4294966272  ;;  %vm99_vm0 = vcmask 58368   ;;  %v98_v1 = vld [vmem:[#allocation4] sm:$0x3]  ;;  %v1495_v3 = vmov 8.0  }
  0x16   :  { %v100_v2 = vsel %vm99_vm0, %v98_v1, 0.0  ;;  %1253 = vrcp.f32 %v1495_v3  ;;  %v1496_v15 = vmov 7.0   ;;  %v1497_v18 = vmov 1   ;;  %v158_v40 = vld [vmem:[#allocation6 + $0x18] sm:$0xff]  ;;  %v157_v41 = vld [vmem:[#allocation6 + $0x10] sm:$0xff]  ;;  %v156_v43 = vld [vmem:[#allocation6 + $0x8] sm:$0xff] }
  0x17   :  { %101 = vadd.xlane.f32.xlu0 %v100_v2  ;;  %1255 = vrcp.f32 %v1496_v15  ;;  %1238 = vset.pattern.permute.xlu1 %v1497_v18  ;;  %v1498_v19 = vmov 0   ;;  %v1499_v38 = vmov 3   ;;  %v1500_v39 = vmov 2   ;;  %v1591_v42 = vld [vmem:[#allocation8 + $0x18] sm:$0xff]  ;;  %v1594_v44 = vld [vmem:[#allocation8 + $0x10] sm:$0xff]  ;;  %v155_v45 = vld [vmem:[#allocation6] sm:$0xff] }
  0x18   :  { %1240 = vset.pattern.permute.xlu2 %v1498_v19  ;;  %282 = vmatpush.msra.mxu0 %v158_v40  ;;  %v1598_v46 = vld [vmem:[#allocation8 + $0x8] sm:$0xff]  ;;  %v1602_v47 = vld [vmem:[#allocation8] sm:$0xff]  ;;  %v1501_v48 = vmov 0.0   ;;  %v1615_v50 = vld [vmem:[%s1910_s1] ss:$0 sm:$0xff]  ;;  %vm251_vm8 = vcmask 1041408  }
  0x19   :  { %308 = vmatpush.msra.mxu1 %v1591_v42  ;;  %406 = vmatpush.msra.mxu3 %v1591_v42  ;;  %v1623_v54 = vld [vmem:[%s1911_s2] ss:$0 sm:$0xff]  ;;  %vm253_vm9 = vcmask 1043456   ;;  %vm255_vm10 = vcmask 1045504   ;;  %vm263_vm11 = vcmask 261120   ;;  %s1502_s16 = smov 64  }
  0x1a   :  { %283 = vmatpush.msra.mxu0 %v157_v41  ;;  %vm345_vm12 = vcmask 523264   ;;  %v1719_v41 = vld [vmem:[%s1916_s7] ss:$0 sm:$0xff]  ;;  %vm1176_vm13 = vcmask 523270   ;;  %vm1193_vm14 = vcmask 7174  }
  0x1b   :  { %309 = vmatpush.msra.mxu1 %v1594_v44  ;;  %407 = vmatpush.msra.mxu3 %v1594_v44 }
  0x1c   :  { %v1254_v4 = vpop.eup %1253  ;;  %284 = vmatpush.msra.mxu0 %v156_v43 }
  0x1d   :  { %v104_v5 = vmul.f32 8.0, %v1254_v4  ;;  %vm108_vm1 = vweird.f32 %v1254_v4  ;;  %v1256_v16 = vpop.eup %1255  ;;  %310 = vmatpush.msra.mxu1 %v1598_v46  ;;  %408 = vmatpush.msra.mxu3 %v1598_v46 }
  0x1e   :  { %v117_v17 = vmul.f32 7.0, %v1256_v16  ;;  %vm121_vm2 = vweird.f32 %v1256_v16  ;;  %285 = vmatpush.msra.mxu0 %v155_v45 }
  0x1f   :  { %v105_v6 = vsub.f32 1.0, %v104_v5  ;;  %311 = vmatpush.msra.mxu1 %v1602_v47  ;;  %409 = vmatpush.msra.mxu3 %v1602_v47 }
  0x20   :  { %v118_v20 = vsub.f32 1.0, %v117_v17  ;;  %312 = vmatmul.f32.vlgmr.msra.gmra.mxu1 %v1501_v48 }
  0x21   :  { %v106_v7 = vmul.f32 %v1254_v4, %v105_v6  ;;  %518 = vmatpush.msrb.mxu1 %v1591_v42 }
  0x22   :  { %v119_v21 = vmul.f32 %v1256_v16, %v118_v20 }
  0x23   :  { %v107_v8 = vadd.f32 %v1254_v4, %v106_v7  ;;  %519 = vmatpush.msrb.mxu1 %v1594_v44 }
  0x24   :  { %v120_v22 = vadd.f32 %v1256_v16, %v119_v21 }
  0x25   :  { %v109_v9 = vsel %vm108_vm1, %v1254_v4, %v107_v8  ;;  %520 = vmatpush.msrb.mxu1 %v1598_v46 }
  0x26   :  { %v122_v23 = vsel %vm121_vm2, %v1256_v16, %v120_v22 }
  0x27   :  { %521 = vmatpush.msrb.mxu1 %v1602_v47 }
  0x29   :  { %630 = vmatpush.msra.mxu1 %v1591_v42 }
  0x2b   :  { %631 = vmatpush.msra.mxu1 %v1594_v44 }
  0x2d   :  { %632 = vmatpush.msra.mxu1 %v1598_v46 }
  0x2f   :  { %633 = vmatpush.msra.mxu1 %v1602_v47 }
  0x8a   :  { %v102_v10 = vpop.xlane.xlu0 %101 }
  0x8b   :  { %v1579_v11 = vmul.f32 %v109_v9, %v102_v10  ;;  %v1640_v9 = vld [vmem:[%s1914_s5] ss:$0 sm:$0xff]  ;;  %s1503_s5 = smov 32  }
  0x8d   :  { %v111_v12 = vsub.f32 %v98_v1, %v1579_v11 }
  0x8f   :  { %v112_v13 = vmul.f32 %v111_v12, %v111_v12 }
  0x91   :  { %v113_v14 = vsel %vm99_vm0, %v112_v13, 0.0 }
  0x92   :  { %114 = vadd.xlane.f32.xlu0 %v113_v14 }
 0x105   :  { %v115_v24 = vpop.xlane.xlu0 %114 }
 0x106   :  { %v123_v25 = vmul.f32 %v122_v23, %v115_v24 }
 0x108   :  { %1257 = vrsqrt.f32 %v123_v25  ;;  %vm130_vm4 = vweird.f32 %v123_v25  ;;  %vm141_vm6 = vcmp.eq.f32.partialorder %v123_v25, inf  ;;  %v144_v35 = vand.u32 2147483648, %v123_v25 }
 0x109   :  { %vm143_vm7 = vcmp.eq.f32.partialorder %v123_v25, 0.0 }
 0x10e   :  { %v1258_v26 = vpop.eup %1257 }
 0x10f   :  { %v125_v27 = vmul.f32 %v1258_v26, %v123_v25  ;;  %vm131_vm3 = vweird.f32 %v1258_v26 }
 0x110   :  { %vm132_vm5 = vmor %vm130_vm4, %vm131_vm3 }
 0x111   :  { %v126_v28 = vmul.f32 %v1258_v26, %v125_v27  ;;  %v1652_v27 = vld [vmem:[#allocation9 + $0x38] sm:$0xff] }
 0x112   :  { %357 = vmatpush.msra.mxu2 %v1652_v27  ;;  %466 = vmatpush.msrb.mxu0 %v1652_v27 }
 0x113   :  { %v127_v29 = vmul.f32 0.5, %v126_v28  ;;  %v1654_v28 = vld [vmem:[#allocation9 + $0x30] sm:$0xff]  ;;  %578 = vmatpush.msrb.mxu3 %v1652_v27 }
 0x114   :  { %358 = vmatpush.msra.mxu2 %v1654_v28  ;;  %467 = vmatpush.msrb.mxu0 %v1654_v28 }
 0x115   :  { %v128_v30 = vsub.f32 1.5, %v127_v29  ;;  %v1658_v29 = vld [vmem:[#allocation9 + $0x28] sm:$0xff]  ;;  %579 = vmatpush.msrb.mxu3 %v1654_v28 }
 0x116   :  { %359 = vmatpush.msra.mxu2 %v1658_v29  ;;  %468 = vmatpush.msrb.mxu0 %v1658_v29 }
 0x117   :  { %v129_v31 = vmul.f32 %v1258_v26, %v128_v30  ;;  %v1663_v30 = vld [vmem:[#allocation9 + $0x20] sm:$0xff]  ;;  %580 = vmatpush.msrb.mxu3 %v1658_v29 }
 0x118   :  { %360 = vmatpush.msra.mxu2 %v1663_v30  ;;  %469 = vmatpush.msrb.mxu0 %v1663_v30 }
 0x119   :  { %v133_v32 = vsel %vm132_vm5, %v1258_v26, %v129_v31  ;;  %v140_v33 = vmul.f32 %v129_v31, %v123_v25  ;;  %v1668_v31 = vld [vmem:[#allocation9 + $0x18] sm:$0xff]  ;;  %581 = vmatpush.msrb.mxu3 %v1663_v30 }
 0x11a   :  { %v1583_v34 = vmul.f32 %v133_v32, %v111_v12  ;;  %v313_v12 = vpop.f32.mrf.mxu1  ;;  %v1673_v32 = vld [vmem:[#allocation9 + $0x10] sm:$0xff]  ;;  %361 = vmatpush.msra.mxu2 %v1668_v31  ;;  %470 = vmatpush.msrb.mxu0 %v1668_v31 }
 0x11b   :  { %v142_v36 = vsel %vm141_vm6, %v123_v25, %v140_v33  ;;  %v1678_v33 = vld [vmem:[#allocation9 + $0x8] sm:$0xff]  ;;  %582 = vmatpush.msrb.mxu3 %v1668_v31 }
 0x11c   :  { %178 = vperm.xlu2 %1240, %v1583_v34   ;;  %185 = vperm.xlu1 %1238, %v1583_v34   ;;  %v1587_v37 = vsel %vm143_vm7, %v144_v35, %v142_v36 }
 0x11d   :  { %362 = vmatpush.msra.mxu2 %v1673_v32  ;;  %471 = vmatpush.msrb.mxu0 %v1673_v32 }
 0x11e   :  { %583 = vmatpush.msrb.mxu3 %v1673_v32 }
 0x11f   :  { %363 = vmatpush.msra.mxu2 %v1678_v33  ;;  %472 = vmatpush.msrb.mxu0 %v1678_v33 }
 0x120   :  { %584 = vmatpush.msrb.mxu3 %v1678_v33 }
 0x124   :  { %1241 = vset.pattern.permute.xlu2 %v1499_v38  ;;  %1239 = vset.pattern.permute.xlu1 %v1500_v39  ;;  %v1688_v38 = vld [vmem:[#allocation9] sm:$0xff] }
 0x125   :  { %199 = vperm.xlu2 %1241, %v1583_v34   ;;  %192 = vperm.xlu1 %1239, %v1583_v34  }
 0x126   :  { %364 = vmatpush.msra.mxu2 %v1688_v38  ;;  %473 = vmatpush.msrb.mxu0 %v1688_v38 }
 0x127   :  { %585 = vmatpush.msrb.mxu3 %v1688_v38 }
 0x128   :  { %690 = vmatpush.msrb.mxu2 %v1652_v27 }
 0x12a   :  { %691 = vmatpush.msrb.mxu2 %v1654_v28 }
 0x12c   :  { %692 = vmatpush.msrb.mxu2 %v1658_v29 }
 0x12e   :  { %693 = vmatpush.msrb.mxu2 %v1663_v30 }
 0x130   :  { %694 = vmatpush.msrb.mxu2 %v1668_v31 }
 0x132   :  { %695 = vmatpush.msrb.mxu2 %v1673_v32 }
 0x134   :  { %696 = vmatpush.msrb.mxu2 %v1678_v33 }
 0x136   :  { %697 = vmatpush.msrb.mxu2 %v1688_v38 }
 0x176   :  { %v179_v49 = vpop.permute.xlu2 %178 }
 0x177   :  { %v181_v57 = vmul.f32 %v1615_v50, %v179_v49 }
 0x179   :  { %v182_v62 = vadd.f32 %v1623_v54, %v181_v57 }
 0x17b   :  { %v183_v3 = vmax.f32 %v182_v62, 0.0 }
 0x17f   :  { %v200_v53 = vpop.permute.xlu2 %199 }
 0x180   :  { %v202_v55 = vmul.f32 %v1615_v50, %v200_v53 }
 0x182   :  { %v203_v58 = vadd.f32 %v1623_v54, %v202_v55 }
 0x184   :  { %v204_v0 = vmax.f32 %v203_v58, 0.0 }
 0x186   :  { %v240_v5 = vrot.slane %v204_v0, 2 }
 0x18e   :  { %v186_v51 = vpop.permute.xlu1 %185 }
 0x18f   :  { %v188_v52 = vmul.f32 %v1615_v50, %v186_v51 }
 0x191   :  { %v189_v56 = vadd.f32 %v1623_v54, %v188_v52 }
 0x193   :  { %v190_v59 = vmax.f32 %v189_v56, 0.0 }
 0x195   :  { %v234_v1 = vrot.slane %v190_v59, 6  ;;  %v1504_v59 = vmov 5  }
 0x196   :  { %1242 = vset.pattern.permute.xlu0 %v1504_v59 }
 0x197   :  { %v193_v60 = vpop.permute.xlu1 %192  ;;  %v252_v6 = vsel %vm251_vm8, %v183_v3, %v234_v1 }
 0x198   :  { %v195_v61 = vmul.f32 %v1615_v50, %v193_v60 }
 0x19a   :  { %v196_v63 = vadd.f32 %v1623_v54, %v195_v61 }
 0x19c   :  { %v197_v2 = vmax.f32 %v196_v63, 0.0 }
 0x19e   :  { %v237_v4 = vrot.slane %v197_v2, 4 }
 0x1a0   :  { %v254_v7 = vsel %vm253_vm9, %v252_v6, %v237_v4  ;;  %v1505_v6 = vmov 6  }
 0x1a1   :  { %v256_v8 = vsel %vm255_vm10, %v254_v7, %v240_v5  ;;  %1243 = vset.pattern.permute.xlu1 %v1505_v6  ;;  %v1506_v7 = vmov 7  }
 0x1a2   :  { %1202 = vmatmul.msk.f32.vlgmr.msra.gmra.mxu0 %vm263_vm11, %v256_v8 }
 0x1a3   :  { %742 = vmatpush.msra.mxu0 %v1591_v42 }
 0x1a5   :  { %743 = vmatpush.msra.mxu0 %v1594_v44 }
 0x1a7   :  { %744 = vmatpush.msra.mxu0 %v1598_v46 }
 0x1a9   :  { %745 = vmatpush.msra.mxu0 %v1602_v47 }
 0x21f   :  { %v287_v10 = vpop.f32.mrf.mxu0 }
 0x220   :  { %v1643_v13 = vadd.f32 %v1640_v9, %v287_v10 }
 0x222   :  { %v316_v14 = vadd.f32 %v313_v12, %v1643_v13 }
 0x224   :  { %1259 = vtanh.f32 %v316_v14  ;;  %v317_v16 = vsub.f32 0.0, %v316_v14 }
 0x226   :  { %v318_v17 = vmul.f32 1.442695, %v317_v16 }
 0x228   :  { %1261 = vpow2.f32 %v318_v17 }
 0x22a   :  { %v1260_v15 = vpop.eup %1259 }
 0x22b   :  { %325 = vrot.lane.b32.xlu0 %v1260_v15, %s1502_s16  ;;  %v1507_v15 = vmov 4  }
 0x22c   :  { %1244 = vset.pattern.permute.xlu2 %v1507_v15 }
 0x22e   :  { %v1262_v18 = vpop.eup %1261 }
 0x22f   :  { %v320_v19 = vadd.f32 1.0, %v1262_v18 }
 0x231   :  { %1263 = vrcp.f32 %v320_v19 }
 0x237   :  { %v1264_v20 = vpop.eup %1263 }
 0x238   :  { %v323_v23 = vmul.f32 0.0, %v1264_v20 }
 0x29d   :  { %v326_v21 = vpop.permute.xlu0 %325 }
 0x29e   :  { %v328_v22 = vmul.f32 %v1264_v20, %v326_v21 }
 0x2a0   :  { %330 = vrot.lane.b32.xlu1 %v328_v22, %s1503_s5 }
 0x312   :  { %v331_v24 = vpop.permute.xlu1 %330 }
 0x313   :  { %v1648_v25 = vadd.f32 %v331_v24, %v323_v23 }
 0x315   :  { %1265 = vtanh.f32 %v1648_v25  ;;  %v425_v16 = vrot.slane %v1648_v25, 6 }
 0x31b   :  { %v1266_v26 = vpop.eup %1265 }
 0x31c   :  { %336 = vrot.lane.b32.xlu2 %v1266_v26, %s1502_s16 }
 0x376   :  { %v337_v35 = vpop.permute.xlu2 %336 }
 0x377   :  { %v339_v36 = vmul.f32 %v1264_v20, %v337_v35 }
 0x379   :  { %341 = vrot.lane.b32.xlu1 %v339_v36, %s1503_s5 }
 0x3eb   :  { %v342_v39 = vpop.permute.xlu1 %341 }
 0x3ec   :  { %1205 = vmatmul.msk.f32.vlgmr.msra.gmra.mxu3 %vm263_vm11, %v342_v39  ;;  %v344_v40 = vsel %vm263_vm11, %v342_v39, 0.0 }
 0x3ed   :  { %1204 = vmatmul.msk.f32.vlgmr.msra.gmra.mxu2 %vm345_vm12, %v344_v40  ;;  %846 = vmatpush.msra.mxu3 %v1591_v42 }
 0x3ee   :  { %958 = vmatpush.msra.mxu2 %v1591_v42 }
 0x3ef   :  { %847 = vmatpush.msra.mxu3 %v1594_v44 }
 0x3f0   :  { %959 = vmatpush.msra.mxu2 %v1594_v44 }
 0x3f1   :  { %848 = vmatpush.msra.mxu3 %v1598_v46 }
 0x3f2   :  { %960 = vmatpush.msra.mxu2 %v1598_v46 }
 0x3f3   :  { %849 = vmatpush.msra.mxu3 %v1602_v47 }
 0x3f4   :  { %961 = vmatpush.msra.mxu2 %v1602_v47 }
 0x46f   :  { %v411_v43 = vpop.f32.mrf.mxu3 }
 0x470   :  { %v415_v45 = vrot.slane %v411_v43, 6  ;;  %v366_v48 = vpop.f32.mrf.mxu2 }
 0x471   :  { %v367_v49 = vadd.f32 %v1719_v41, %v366_v48 }
 0x472   :  { %v417_v51 = vadd.f32 %v415_v45, %v1643_v13 }
 0x473   :  { %1267 = vtanh.f32 %v367_v49  ;;  %v369_v55 = vsub.f32 0.0, %v367_v49 }
 0x474   :  { %1269 = vtanh.f32 %v417_v51  ;;  %v418_v60 = vsub.f32 0.0, %v417_v51 }
 0x475   :  { %v370_v56 = vmul.f32 1.442695, %v369_v55 }
 0x476   :  { %v419_v0 = vmul.f32 1.442695, %v418_v60 }
 0x477   :  { %1271 = vpow2.f32 %v370_v56 }
 0x479   :  { %v1268_v52 = vpop.eup %1267 }
 0x47a   :  { %v1270_v53 = vpop.eup %1269  ;;  %377 = vrot.lane.b32.xlu2 %v1268_v52, %s1502_s16 }
 0x47b   :  { %429 = vrot.lane.b32.xlu1 %v1270_v53, %s1502_s16 }
 0x47d   :  { %v1272_v57 = vpop.eup %1271 }
 0x47e   :  { %v372_v58 = vadd.f32 1.0, %v1272_v57 }
 0x480   :  { %1273 = vrcp.f32 %v372_v58 }
 0x481   :  { %1275 = vpow2.f32 %v419_v0 }
 0x486   :  { %v1274_v61 = vpop.eup %1273 }
 0x487   :  { %v1276_v1 = vpop.eup %1275  ;;  %v375_v8 = vmul.f32 0.0, %v1274_v61 }
 0x488   :  { %v421_v2 = vadd.f32 1.0, %v1276_v1 }
 0x48a   :  { %1277 = vrcp.f32 %v421_v2 }
 0x490   :  { %v1278_v3 = vpop.eup %1277 }
 0x491   :  { %v427_v17 = vmul.f32 %v1278_v3, %v425_v16 }
 0x4d4   :  { %v378_v62 = vpop.permute.xlu2 %377 }
 0x4d5   :  { %v380_v63 = vmul.f32 %v1274_v61, %v378_v62 }
 0x4d7   :  { %382 = vrot.lane.b32.xlu2 %v380_v63, %s1503_s5 }
 0x4ed   :  { %v430_v4 = vpop.permute.xlu1 %429 }
 0x4ee   :  { %v432_v5 = vmul.f32 %v1278_v3, %v430_v4 }
 0x4f0   :  { %434 = vrot.lane.b32.xlu0 %v432_v5, %s1503_s5 }
 0x4f8   :  { %213 = vperm.xlu0 %1242, %v1583_v34  }
 0x500   :  { %1246 = vset.pattern.permute.xlu0 %v1506_v7 }
 0x531   :  { %v383_v10 = vpop.permute.xlu2 %382 }
 0x532   :  { %v1728_v12 = vadd.f32 %v383_v10, %v375_v8 }
 0x534   :  { %1279 = vtanh.f32 %v1728_v12 }
 0x53a   :  { %v1280_v14 = vpop.eup %1279 }
 0x53b   :  { %388 = vrot.lane.b32.xlu1 %v1280_v14, %s1502_s16 }
 0x543   :  { %220 = vperm.xlu1 %1243, %v1583_v34  }
 0x54b   :  { %1245 = vset.pattern.permute.xlu1 %v1506_v7 }
 0x54c   :  { %227 = vperm.xlu1 %1245, %v1583_v34  }
 0x562   :  { %v435_v18 = vpop.permute.xlu0 %434 }
 0x563   :  { %v1735_v19 = vadd.f32 %v435_v18, %v427_v17 }
 0x565   :  { %1281 = vtanh.f32 %v1735_v19 }
 0x56a   :  { %v214_v26 = vpop.permute.xlu0 %213 }
 0x56b   :  { %v1282_v20 = vpop.eup %1281  ;;  %v216_v36 = vmul.f32 %v1615_v50, %v214_v26 }
 0x56c   :  { %440 = vrot.lane.b32.xlu2 %v1282_v20, %s1502_s16 }
 0x574   :  { %206 = vperm.xlu2 %1244, %v1583_v34   ;;  %v217_v34 = vadd.f32 %v1623_v54, %v216_v36 }
 0x576   :  { %v218_v52 = vmax.f32 %v217_v34, 0.0 }
 0x578   :  { %v243_v58 = vrot.slane %v218_v52, 6 }
 0x5ad   :  { %v389_v21 = vpop.permute.xlu1 %388 }
 0x5ae   :  { %v391_v22 = vmul.f32 %v1274_v61, %v389_v21 }
 0x5b0   :  { %v449_v23 = vrot.slane %v391_v22, 6 }
 0x5b2   :  { %450 = vrot.lane.b32.xlu0 %v449_v23, %s1502_s16 }
 0x5b5   :  { %v221_v24 = vpop.permute.xlu1 %220 }
 0x5b6   :  { %v223_v40 = vmul.f32 %v1615_v50, %v221_v24 }
 0x5b8   :  { %v224_v48 = vadd.f32 %v1623_v54, %v223_v40 }
 0x5ba   :  { %v225_v55 = vmax.f32 %v224_v48, 0.0 }
 0x5bc   :  { %v246_v60 = vrot.slane %v225_v55, 4 }
 0x5be   :  { %v228_v35 = vpop.permute.xlu1 %227 }
 0x5bf   :  { %v230_v43 = vmul.f32 %v1615_v50, %v228_v35 }
 0x5c1   :  { %v231_v49 = vadd.f32 %v1623_v54, %v230_v43 }
 0x5c3   :  { %v232_v56 = vmax.f32 %v231_v49, 0.0  ;;  %v537_v49 = vrot.slane %v1735_v19, 6 }
 0x5c5   :  { %v249_v61 = vrot.slane %v232_v56, 2 }
 0x5c6   :  { %v441_v25 = vpop.permute.xlu2 %440 }
 0x5c7   :  { %v443_v39 = vmul.f32 %v1278_v3, %v441_v25 }
 0x5c9   :  { %v501_v45 = vrot.slane %v443_v39, 2  ;;  %445 = vrot.lane.b32.xlu2 %v443_v39, %s1503_s5 }
 0x5cb   :  { %502 = vrot.lane.b32.xlu1 %v501_v45, %s1503_s5 }
 0x5ce   :  { %v207_v51 = vpop.permute.xlu2 %206 }
 0x5cf   :  { %v209_v53 = vmul.f32 %v1615_v50, %v207_v51 }
 0x5d1   :  { %v210_v57 = vadd.f32 %v1623_v54, %v209_v53 }
 0x5d3   :  { %v211_v59 = vmax.f32 %v210_v57, 0.0 }
 0x5d5   :  { %v257_v62 = vsel %vm251_vm8, %v211_v59, %v243_v58 }
 0x5d6   :  { %v258_v63 = vsel %vm253_vm9, %v257_v62, %v246_v60 }
 0x5d7   :  { %v259_v0 = vsel %vm255_vm10, %v258_v63, %v249_v61 }
 0x5d8   :  { %1203 = vmatmul.msk.f32.gmra.mxu0 %vm263_vm11, %v259_v0 }
 0x623   :  { %v446_v1 = vpop.permute.xlu2 %445 }
 0x624   :  { %v451_v2 = vpop.permute.xlu0 %450 }
 0x625   :  { %v453_v50 = vsel %vm263_vm11, %v446_v1, %v451_v2 }
 0x626   :  { %v455_v3 = vrot.slane %v453_v50, 2 }
 0x628   :  { %1206 = vmatmul.msk.f32.vlgmr.msrb.gmra.mxu0 %vm345_vm12, %v455_v3 }
 0x629   :  { %906 = vmatpush.msrb.mxu0 %v1652_v27 }
 0x62b   :  { %907 = vmatpush.msrb.mxu0 %v1654_v28 }
 0x62d   :  { %908 = vmatpush.msrb.mxu0 %v1658_v29 }
 0x62f   :  { %909 = vmatpush.msrb.mxu0 %v1663_v30 }
 0x631   :  { %910 = vmatpush.msrb.mxu0 %v1668_v31 }
 0x633   :  { %911 = vmatpush.msrb.mxu0 %v1673_v32 }
 0x635   :  { %912 = vmatpush.msrb.mxu0 %v1678_v33 }
 0x637   :  { %913 = vmatpush.msrb.mxu0 %v1688_v38 }
 0x63d   :  { %v503_v54 = vpop.permute.xlu1 %502 }
 0x63e   :  { %1207 = vmatmul.msk.f32.vlgmr.msrb.gmra.mxu1 %vm263_vm11, %v503_v54 }
 0x63f   :  { %797 = vmatpush.msrb.mxu1 %v1652_v27 }
 0x641   :  { %798 = vmatpush.msrb.mxu1 %v1654_v28 }
 0x643   :  { %799 = vmatpush.msrb.mxu1 %v1658_v29 }
 0x645   :  { %800 = vmatpush.msrb.mxu1 %v1663_v30 }
 0x647   :  { %801 = vmatpush.msrb.mxu1 %v1668_v31 }
 0x649   :  { %802 = vmatpush.msrb.mxu1 %v1673_v32 }
 0x64b   :  { %803 = vmatpush.msrb.mxu1 %v1678_v33 }
 0x64d   :  { %804 = vmatpush.msrb.mxu1 %v1688_v38 }
 0x655   :  { %v1774_v4 = vpop.f32.mrf.mxu0 }
 0x6a5   :  { %v475_v5 = vpop.f32.mrf.mxu0 }
 0x6a6   :  { %v476_v6 = vadd.f32 %v1719_v41, %v475_v5 }
 0x6a8   :  { %1283 = vtanh.f32 %v476_v6  ;;  %v478_v16 = vsub.f32 0.0, %v476_v6 }
 0x6aa   :  { %v479_v17 = vmul.f32 1.442695, %v478_v16 }
 0x6ae   :  { %v1284_v7 = vpop.eup %1283 }
 0x6af   :  { %486 = vrot.lane.b32.xlu2 %v1284_v7, %s1502_s16 }
 0x6bb   :  { %v523_v8 = vpop.f32.mrf.mxu1 }
 0x6bc   :  { %v527_v10 = vrot.slane %v523_v8, 4 }
 0x6be   :  { %v529_v14 = vadd.f32 %v527_v10, %v1643_v13 }
 0x6c0   :  { %1285 = vtanh.f32 %v529_v14  ;;  %v530_v24 = vsub.f32 0.0, %v529_v14 }
 0x6c1   :  { %1287 = vpow2.f32 %v479_v17 }
 0x6c2   :  { %v531_v26 = vmul.f32 1.442695, %v530_v24 }
 0x6c6   :  { %v1286_v15 = vpop.eup %1285 }
 0x6c7   :  { %541 = vrot.lane.b32.xlu0 %v1286_v15, %s1502_s16  ;;  %v1288_v18 = vpop.eup %1287 }
 0x6c8   :  { %v481_v20 = vadd.f32 1.0, %v1288_v18 }
 0x6ca   :  { %1289 = vrcp.f32 %v481_v20 }
 0x6cb   :  { %1291 = vpow2.f32 %v531_v26 }
 0x6d0   :  { %v1290_v21 = vpop.eup %1289 }
 0x6d1   :  { %v1292_v35 = vpop.eup %1291  ;;  %v484_v43 = vmul.f32 %v1290_v21, %v1728_v12 }
 0x6d2   :  { %v533_v25 = vadd.f32 1.0, %v1292_v35 }
 0x6d4   :  { %1293 = vrcp.f32 %v533_v25 }
 0x6da   :  { %v1294_v36 = vpop.eup %1293 }
 0x6db   :  { %v539_v51 = vmul.f32 %v1294_v36, %v537_v49 }
 0x709   :  { %v487_v22 = vpop.permute.xlu2 %486 }
 0x70a   :  { %v489_v23 = vmul.f32 %v1290_v21, %v487_v22 }
 0x70c   :  { %491 = vrot.lane.b32.xlu1 %v489_v23, %s1503_s5 }
 0x739   :  { %v542_v39 = vpop.permute.xlu0 %541 }
 0x73a   :  { %v544_v40 = vmul.f32 %v1294_v36, %v542_v39 }
 0x73c   :  { %546 = vrot.lane.b32.xlu2 %v544_v40, %s1503_s5 }
 0x77e   :  { %v492_v45 = vpop.permute.xlu1 %491 }
 0x77f   :  { %v1783_v34 = vadd.f32 %v492_v45, %v484_v43 }
 0x781   :  { %1295 = vtanh.f32 %v1783_v34 }
 0x787   :  { %v1296_v48 = vpop.eup %1295 }
 0x788   :  { %497 = vrot.lane.b32.xlu0 %v1296_v48, %s1502_s16 }
 0x796   :  { %v547_v52 = vpop.permute.xlu2 %546 }
 0x797   :  { %v1788_v53 = vadd.f32 %v547_v52, %v539_v51 }
 0x799   :  { %1297 = vtanh.f32 %v1788_v53  ;;  %v649_v26 = vrot.slane %v1788_v53, 6 }
 0x79f   :  { %v1298_v55 = vpop.eup %1297 }
 0x7a0   :  { %552 = vrot.lane.b32.xlu1 %v1298_v55, %s1502_s16 }
 0x7fa   :  { %v498_v12 = vpop.permute.xlu0 %497 }
 0x7fb   :  { %v500_v56 = vmul.f32 %v1290_v21, %v498_v12 }
 0x7fd   :  { %v561_v57 = vrot.slane %v500_v56, 4  ;;  %v1839_v56 = vadd.f32 %v1640_v9, %v1774_v4 }
 0x7ff   :  { %562 = vrot.lane.b32.xlu0 %v561_v57, %s1502_s16 }
 0x812   :  { %v553_v58 = vpop.permute.xlu1 %552 }
 0x813   :  { %v555_v59 = vmul.f32 %v1294_v36, %v553_v58 }
 0x815   :  { %v613_v60 = vrot.slane %v555_v59, 4  ;;  %557 = vrot.lane.b32.xlu2 %v555_v59, %s1503_s5 }
 0x817   :  { %614 = vrot.lane.b32.xlu1 %v613_v60, %s1503_s5 }
 0x86f   :  { %v558_v19 = vpop.permute.xlu2 %557 }
 0x871   :  { %v563_v61 = vpop.permute.xlu0 %562 }
 0x872   :  { %v565_v62 = vsel %vm263_vm11, %v558_v19, %v563_v61 }
 0x873   :  { %v567_v63 = vrot.slane %v565_v62, 4 }
 0x875   :  { %1208 = vmatmul.msk.f32.vlgmr.msrb.gmra.mxu3 %vm345_vm12, %v567_v63 }
 0x876   :  { %1018 = vmatpush.msrb.mxu3 %v1652_v27 }
 0x878   :  { %1019 = vmatpush.msrb.mxu3 %v1654_v28 }
 0x87a   :  { %1020 = vmatpush.msrb.mxu3 %v1658_v29 }
 0x87c   :  { %1021 = vmatpush.msrb.mxu3 %v1663_v30 }
 0x87e   :  { %1022 = vmatpush.msrb.mxu3 %v1668_v31 }
 0x880   :  { %1023 = vmatpush.msrb.mxu3 %v1673_v32 }
 0x882   :  { %1024 = vmatpush.msrb.mxu3 %v1678_v33 }
 0x884   :  { %1025 = vmatpush.msrb.mxu3 %v1688_v38 }
 0x889   :  { %v615_v0 = vpop.permute.xlu1 %614 }
 0x88a   :  { %1209 = vmatmul.msk.f32.vlgmr.msra.gmra.mxu1 %vm263_vm11, %v615_v0 }
 0x88b   :  { %1070 = vmatpush.msra.mxu1 %v1591_v42 }
 0x88d   :  { %1071 = vmatpush.msra.mxu1 %v1594_v44 }
 0x88f   :  { %1072 = vmatpush.msra.mxu1 %v1598_v46 }
 0x891   :  { %1073 = vmatpush.msra.mxu1 %v1602_v47 }
 0x8f8   :  { %v587_v1 = vpop.f32.mrf.mxu3 }
 0x8f9   :  { %v588_v2 = vadd.f32 %v1719_v41, %v587_v1 }
 0x8fb   :  { %1299 = vtanh.f32 %v588_v2  ;;  %v590_v46 = vsub.f32 0.0, %v588_v2 }
 0x8fd   :  { %v591_v47 = vmul.f32 1.442695, %v590_v46 }
 0x901   :  { %v1300_v50 = vpop.eup %1299 }
 0x902   :  { %598 = vrot.lane.b32.xlu0 %v1300_v50, %s1502_s16 }
 0x907   :  { %v635_v3 = vpop.f32.mrf.mxu1 }
 0x908   :  { %v639_v54 = vrot.slane %v635_v3, 2 }
 0x90a   :  { %v641_v5 = vadd.f32 %v639_v54, %v1643_v13 }
 0x90c   :  { %1301 = vtanh.f32 %v641_v5  ;;  %v642_v42 = vsub.f32 0.0, %v641_v5 }
 0x90e   :  { %v643_v44 = vmul.f32 1.442695, %v642_v42 }
 0x910   :  { %1303 = vpow2.f32 %v643_v44 }
 0x911   :  { %1305 = vpow2.f32 %v591_v47 }
 0x912   :  { %v1302_v6 = vpop.eup %1301 }
 0x913   :  { %653 = vrot.lane.b32.xlu2 %v1302_v6, %s1502_s16 }
 0x916   :  { %v1304_v7 = vpop.eup %1303 }
 0x917   :  { %v645_v8 = vadd.f32 1.0, %v1304_v7  ;;  %v1306_v10 = vpop.eup %1305 }
 0x918   :  { %v593_v14 = vadd.f32 1.0, %v1306_v10 }
 0x919   :  { %1307 = vrcp.f32 %v645_v8 }
 0x91a   :  { %1309 = vrcp.f32 %v593_v14 }
 0x91f   :  { %v1308_v15 = vpop.eup %1307 }
 0x920   :  { %v1310_v13 = vpop.eup %1309  ;;  %v651_v35 = vmul.f32 %v1308_v15, %v649_v26 }
 0x921   :  { %v596_v21 = vmul.f32 %v1310_v13, %v1783_v34 }
 0x96d   :  { %v654_v16 = vpop.permute.xlu2 %653 }
 0x96e   :  { %v656_v17 = vmul.f32 %v1308_v15, %v654_v16 }
 0x970   :  { %658 = vrot.lane.b32.xlu1 %v656_v17, %s1503_s5 }
 0x974   :  { %v599_v18 = vpop.permute.xlu0 %598 }
 0x975   :  { %v601_v20 = vmul.f32 %v1310_v13, %v599_v18 }
 0x977   :  { %603 = vrot.lane.b32.xlu2 %v601_v20, %s1503_s5 }
 0x9d1   :  { %v604_v22 = vpop.permute.xlu2 %603 }
 0x9d2   :  { %v1817_v23 = vadd.f32 %v604_v22, %v596_v21 }
 0x9d4   :  { %1311 = vtanh.f32 %v1817_v23 }
 0x9da   :  { %v1312_v24 = vpop.eup %1311 }
 0x9db   :  { %609 = vrot.lane.b32.xlu1 %v1312_v24, %s1502_s16 }
 0x9e2   :  { %v659_v25 = vpop.permute.xlu1 %658 }
 0x9e3   :  { %v661_v36 = vadd.f32 %v659_v25, %v651_v35 }
 0x9e5   :  { %1313 = vtanh.f32 %v661_v36  ;;  %v758_v2 = vrot.slane %v661_v36, 6 }
 0x9eb   :  { %v1314_v39 = vpop.eup %1313 }
 0x9ec   :  { %664 = vrot.lane.b32.xlu0 %v1314_v39, %s1502_s16 }
 0xa4d   :  { %v610_v40 = vpop.permute.xlu1 %609 }
 0xa4e   :  { %v612_v43 = vmul.f32 %v1310_v13, %v610_v40 }
 0xa50   :  { %v673_v45 = vrot.slane %v612_v43, 2 }
 0xa52   :  { %674 = vrot.lane.b32.xlu1 %v673_v45, %s1502_s16 }
 0xa5e   :  { %v665_v34 = vpop.permute.xlu0 %664 }
 0xa5f   :  { %v667_v48 = vmul.f32 %v1308_v15, %v665_v34 }
 0xa61   :  { %v725_v49 = vrot.slane %v667_v48, 6  ;;  %669 = vrot.lane.b32.xlu0 %v667_v48, %s1503_s5 }
 0xa63   :  { %726 = vrot.lane.b32.xlu2 %v725_v49, %s1503_s5 }
 0xabd   :  { %v727_v51 = vpop.permute.xlu2 %726 }
 0xabe   :  { %1211 = vmatmul.msk.f32.vlgmr.msra.gmra.mxu0 %vm263_vm11, %v727_v51 }
 0xac4   :  { %v675_v52 = vpop.permute.xlu1 %674 }
 0xad3   :  { %v670_v53 = vpop.permute.xlu0 %669 }
 0xad4   :  { %v677_v55 = vsel %vm263_vm11, %v670_v53, %v675_v52 }
 0xad5   :  { %v679_v12 = vrot.slane %v677_v55, 6 }
 0xad7   :  { %1210 = vmatmul.msk.f32.vlgmr.msrb.gmra.mxu2 %vm345_vm12, %v679_v12 }
 0xad8   :  { %1130 = vmatpush.msrb.mxu2 %v1652_v27 }
 0xada   :  { %1131 = vmatpush.msrb.mxu2 %v1654_v28 }
 0xadc   :  { %1132 = vmatpush.msrb.mxu2 %v1658_v29 }
 0xade   :  { %1133 = vmatpush.msrb.mxu2 %v1663_v30 }
 0xae0   :  { %1134 = vmatpush.msrb.mxu2 %v1668_v31 }
 0xae2   :  { %1135 = vmatpush.msrb.mxu2 %v1673_v32 }
 0xae4   :  { %1136 = vmatpush.msrb.mxu2 %v1678_v33 }
 0xae6   :  { %1137 = vmatpush.msrb.mxu2 %v1688_v38 }
 0xb3b   :  { %v747_v57 = vpop.f32.mrf.mxu0 }
 0xb3c   :  { %v750_v27 = vadd.f32 %v747_v57, %v1839_v56 }
 0xb3e   :  { %1315 = vtanh.f32 %v750_v27  ;;  %v751_v32 = vsub.f32 0.0, %v750_v27 }
 0xb40   :  { %v752_v33 = vmul.f32 1.442695, %v751_v32 }
 0xb44   :  { %v1316_v28 = vpop.eup %1315 }
 0xb45   :  { %762 = vrot.lane.b32.xlu2 %v1316_v28, %s1502_s16 }
 0xb5a   :  { %v699_v29 = vpop.f32.mrf.mxu2 }
 0xb5b   :  { %v700_v30 = vadd.f32 %v1719_v41, %v699_v29 }
 0xb5d   :  { %1317 = vtanh.f32 %v700_v30  ;;  %v702_v60 = vsub.f32 0.0, %v700_v30 }
 0xb5e   :  { %1319 = vpow2.f32 %v752_v33 }
 0xb5f   :  { %v703_v19 = vmul.f32 1.442695, %v702_v60 }
 0xb63   :  { %v1318_v31 = vpop.eup %1317 }
 0xb64   :  { %710 = vrot.lane.b32.xlu0 %v1318_v31, %s1502_s16  ;;  %v1320_v38 = vpop.eup %1319 }
 0xb65   :  { %v754_v9 = vadd.f32 1.0, %v1320_v38 }
 0xb67   :  { %1321 = vrcp.f32 %v754_v9 }
 0xb68   :  { %1323 = vpow2.f32 %v703_v19 }
 0xb6d   :  { %v1322_v4 = vpop.eup %1321 }
 0xb6e   :  { %v1324_v61 = vpop.eup %1323  ;;  %v760_v50 = vmul.f32 %v1322_v4, %v758_v2 }
 0xb6f   :  { %v705_v62 = vadd.f32 1.0, %v1324_v61 }
 0xb71   :  { %1325 = vrcp.f32 %v705_v62 }
 0xb77   :  { %v1326_v63 = vpop.eup %1325 }
 0xb78   :  { %v708_v6 = vmul.f32 %v1326_v63, %v1817_v23 }
 0xb9f   :  { %v763_v58 = vpop.permute.xlu2 %762 }
 0xba0   :  { %v765_v59 = vmul.f32 %v1322_v4, %v763_v58 }
 0xba2   :  { %767 = vrot.lane.b32.xlu1 %v765_v59, %s1503_s5 }
 0xbd6   :  { %v711_v0 = vpop.permute.xlu0 %710 }
 0xbd7   :  { %v713_v1 = vmul.f32 %v1326_v63, %v711_v0 }
 0xbd9   :  { %715 = vrot.lane.b32.xlu2 %v713_v1, %s1503_s5 }
 0xc14   :  { %v768_v3 = vpop.permute.xlu1 %767 }
 0xc15   :  { %v770_v54 = vadd.f32 %v768_v3, %v760_v50 }
 0xc17   :  { %1327 = vtanh.f32 %v770_v54  ;;  %v865_v53 = vrot.slane %v770_v54, 6 }
 0xc1d   :  { %v1328_v5 = vpop.eup %1327 }
 0xc1e   :  { %773 = vrot.lane.b32.xlu0 %v1328_v5, %s1502_s16 }
 0xc33   :  { %v716_v42 = vpop.permute.xlu2 %715 }
 0xc34   :  { %v718_v44 = vadd.f32 %v716_v42, %v708_v6 }
 0xc36   :  { %1329 = vtanh.f32 %v718_v44 }
 0xc3c   :  { %v1330_v46 = vpop.eup %1329 }
 0xc3d   :  { %721 = vrot.lane.b32.xlu1 %v1330_v46, %s1502_s16 }
 0xc90   :  { %v774_v47 = vpop.permute.xlu0 %773 }
 0xc91   :  { %v776_v7 = vmul.f32 %v1322_v4, %v774_v47 }
 0xc93   :  { %778 = vrot.lane.b32.xlu2 %v776_v7, %s1503_s5 }
 0xcaf   :  { %v722_v8 = vpop.permute.xlu1 %721 }
 0xcb0   :  { %v724_v10 = vmul.f32 %v1326_v63, %v722_v8 }
 0xcb2   :  { %782 = vrot.lane.b32.xlu0 %v724_v10, %s1502_s16 }
 0xced   :  { %v779_v14 = vpop.permute.xlu2 %778 }
 0xcee   :  { %1213 = vmatmul.msk.f32.vlgmr.msra.gmra.mxu3 %vm263_vm11, %v779_v14 }
 0xd24   :  { %v783_v15 = vpop.permute.xlu0 %782 }
 0xd25   :  { %v785_v16 = vsel %vm263_vm11, %v779_v14, %v783_v15 }
 0xd26   :  { %1212 = vmatmul.msk.f32.vlgmr.msrb.gmra.mxu1 %vm345_vm12, %v785_v16 }
 0xd71   :  { %v851_v17 = vpop.f32.mrf.mxu3 }
 0xd72   :  { %v855_v13 = vrot.slane %v851_v17, 6 }
 0xd74   :  { %v857_v18 = vadd.f32 %v855_v13, %v1839_v56 }
 0xd76   :  { %1331 = vtanh.f32 %v857_v18  ;;  %v858_v24 = vsub.f32 0.0, %v857_v18 }
 0xd78   :  { %v859_v26 = vmul.f32 1.442695, %v858_v24 }
 0xd7c   :  { %v1332_v20 = vpop.eup %1331 }
 0xd7d   :  { %869 = vrot.lane.b32.xlu1 %v1332_v20, %s1502_s16 }
 0xda3   :  { %v806_v21 = vpop.f32.mrf.mxu1 }
 0xda4   :  { %v807_v22 = vadd.f32 %v1719_v41, %v806_v21 }
 0xda6   :  { %1333 = vtanh.f32 %v807_v22  ;;  %v809_v36 = vsub.f32 0.0, %v807_v22 }
 0xda7   :  { %1335 = vpow2.f32 %v859_v26 }
 0xda8   :  { %v810_v43 = vmul.f32 1.442695, %v809_v36 }
 0xdac   :  { %v1334_v23 = vpop.eup %1333 }
 0xdad   :  { %817 = vrot.lane.b32.xlu2 %v1334_v23, %s1502_s16  ;;  %v1336_v35 = vpop.eup %1335 }
 0xdae   :  { %v861_v25 = vadd.f32 1.0, %v1336_v35 }
 0xdb0   :  { %1337 = vrcp.f32 %v861_v25 }
 0xdb1   :  { %1339 = vpow2.f32 %v810_v43 }
 0xdb6   :  { %v1338_v39 = vpop.eup %1337 }
 0xdb7   :  { %v1340_v34 = vpop.eup %1339  ;;  %v867_v55 = vmul.f32 %v1338_v39, %v865_v53 }
 0xdb8   :  { %v812_v48 = vadd.f32 1.0, %v1340_v34 }
 0xdba   :  { %1341 = vrcp.f32 %v812_v48 }
 0xdc0   :  { %v1342_v49 = vpop.eup %1341 }
 0xdc1   :  { %v815_v28 = vmul.f32 %v1342_v49, %v718_v44 }
 0xdef   :  { %v870_v40 = vpop.permute.xlu1 %869 }
 0xdf0   :  { %v872_v45 = vmul.f32 %v1338_v39, %v870_v40 }
 0xdf2   :  { %874 = vrot.lane.b32.xlu0 %v872_v45, %s1503_s5 }
 0xe07   :  { %v818_v51 = vpop.permute.xlu2 %817 }
 0xe08   :  { %v820_v52 = vmul.f32 %v1342_v49, %v818_v51 }
 0xe0a   :  { %822 = vrot.lane.b32.xlu1 %v820_v52, %s1503_s5 }
 0xe64   :  { %v875_v12 = vpop.permute.xlu0 %874 }
 0xe65   :  { %v877_v57 = vadd.f32 %v875_v12, %v867_v55 }
 0xe67   :  { %1343 = vtanh.f32 %v877_v57  ;;  %v977_v18 = vrot.slane %v877_v57, 6 }
 0xe6d   :  { %v1344_v27 = vpop.eup %1343 }
 0xe6e   :  { %880 = vrot.lane.b32.xlu2 %v1344_v27, %s1502_s16 }
 0xe7c   :  { %v823_v29 = vpop.permute.xlu1 %822 }
 0xe7d   :  { %v825_v30 = vadd.f32 %v823_v29, %v815_v28 }
 0xe7f   :  { %1345 = vtanh.f32 %v825_v30 }
 0xe85   :  { %v1346_v31 = vpop.eup %1345 }
 0xe86   :  { %828 = vrot.lane.b32.xlu0 %v1346_v31, %s1502_s16 }
 0xec8   :  { %v881_v32 = vpop.permute.xlu2 %880 }
 0xec9   :  { %v883_v33 = vmul.f32 %v1338_v39, %v881_v32 }
 0xecb   :  { %v941_v38 = vrot.slane %v883_v33, 2  ;;  %885 = vrot.lane.b32.xlu2 %v883_v33, %s1503_s5 }
 0xecd   :  { %942 = vrot.lane.b32.xlu1 %v941_v38, %s1503_s5 }
 0xef8   :  { %v829_v9 = vpop.permute.xlu0 %828 }
 0xef9   :  { %v831_v4 = vmul.f32 %v1342_v49, %v829_v9 }
 0xefb   :  { %v889_v58 = vrot.slane %v831_v4, 6 }
 0xefd   :  { %890 = vrot.lane.b32.xlu0 %v889_v58, %s1502_s16 }
 0xf25   :  { %v886_v60 = vpop.permute.xlu2 %885 }
 0xf3f   :  { %v943_v59 = vpop.permute.xlu1 %942 }
 0xf40   :  { %1215 = vmatmul.msk.f32.vlgmr.msra.gmra.mxu2 %vm263_vm11, %v943_v59 }
 0xf6f   :  { %v891_v19 = vpop.permute.xlu0 %890 }
 0xf70   :  { %v893_v61 = vsel %vm263_vm11, %v886_v60, %v891_v19 }
 0xf71   :  { %v895_v62 = vrot.slane %v893_v61, 2 }
 0xf73   :  { %1214 = vmatmul.msk.f32.vlgmr.msrb.gmra.mxu0 %vm345_vm12, %v895_v62 }
 0xfc3   :  { %v963_v63 = vpop.f32.mrf.mxu2 }
 0xfc4   :  { %v967_v0 = vrot.slane %v963_v63, 4 }
 0xfc6   :  { %v969_v1 = vadd.f32 %v967_v0, %v1839_v56 }
 0xfc8   :  { %1347 = vtanh.f32 %v969_v1  ;;  %v970_v5 = vsub.f32 0.0, %v969_v1 }
 0xfca   :  { %v971_v6 = vmul.f32 1.442695, %v970_v5 }
 0xfce   :  { %v1348_v2 = vpop.eup %1347 }
 0xfcf   :  { %981 = vrot.lane.b32.xlu2 %v1348_v2, %s1502_s16 }
 0xff0   :  { %v915_v50 = vpop.f32.mrf.mxu0 }
 0xff1   :  { %v916_v3 = vadd.f32 %v1719_v41, %v915_v50 }
 0xff3   :  { %1349 = vtanh.f32 %v916_v3  ;;  %v918_v8 = vsub.f32 0.0, %v916_v3 }
 0xff4   :  { %1351 = vpow2.f32 %v971_v6 }
 0xff5   :  { %v919_v10 = vmul.f32 1.442695, %v918_v8 }
 0xff9   :  { %v1350_v54 = vpop.eup %1349 }
 0xffa   :  { %926 = vrot.lane.b32.xlu1 %v1350_v54, %s1502_s16  ;;  %v1352_v42 = vpop.eup %1351 }
 0xffb   :  { %v973_v44 = vadd.f32 1.0, %v1352_v42 }
 0xffd   :  { %1353 = vrcp.f32 %v973_v44 }
 0xffe   :  { %1355 = vpow2.f32 %v919_v10 }
0x1003   :  { %v1354_v46 = vpop.eup %1353 }
0x1004   :  { %v1356_v14 = vpop.eup %1355  ;;  %v979_v20 = vmul.f32 %v1354_v46, %v977_v18 }
0x1005   :  { %v921_v15 = vadd.f32 1.0, %v1356_v14 }
0x1007   :  { %1357 = vrcp.f32 %v921_v15 }
0x100d   :  { %v1358_v16 = vpop.eup %1357 }
0x100e   :  { %v924_v24 = vmul.f32 %v1358_v16, %v825_v30 }
0x1029   :  { %v982_v47 = vpop.permute.xlu2 %981 }
0x102a   :  { %v984_v7 = vmul.f32 %v1354_v46, %v982_v47 }
0x102c   :  { %986 = vrot.lane.b32.xlu1 %v984_v7, %s1503_s5 }
0x106c   :  { %v927_v17 = vpop.permute.xlu1 %926 }
0x106d   :  { %v929_v13 = vmul.f32 %v1358_v16, %v927_v17 }
0x106f   :  { %931 = vrot.lane.b32.xlu0 %v929_v13, %s1503_s5 }
0x109e   :  { %v987_v21 = vpop.permute.xlu1 %986 }
0x109f   :  { %v989_v22 = vadd.f32 %v987_v21, %v979_v20 }
0x10a1   :  { %1359 = vtanh.f32 %v989_v22  ;;  %v1089_v0 = vrot.slane %v989_v22, 6 }
0x10a7   :  { %v1360_v23 = vpop.eup %1359 }
0x10a8   :  { %992 = vrot.lane.b32.xlu0 %v1360_v23, %s1502_s16 }
0x10e1   :  { %v932_v26 = vpop.permute.xlu0 %931 }
0x10e2   :  { %v934_v35 = vadd.f32 %v932_v26, %v924_v24 }
0x10e4   :  { %1361 = vtanh.f32 %v934_v35 }
0x10ea   :  { %v1362_v25 = vpop.eup %1361 }
0x10eb   :  { %937 = vrot.lane.b32.xlu2 %v1362_v25, %s1502_s16 }
0x111a   :  { %v993_v36 = vpop.permute.xlu0 %992 }
0x111b   :  { %v995_v39 = vmul.f32 %v1354_v46, %v993_v36 }
0x111d   :  { %v1053_v40 = vrot.slane %v995_v39, 4  ;;  %997 = vrot.lane.b32.xlu1 %v995_v39, %s1503_s5 }
0x111f   :  { %1054 = vrot.lane.b32.xlu0 %v1053_v40, %s1503_s5 }
0x1145   :  { %v938_v43 = vpop.permute.xlu2 %937 }
0x1146   :  { %v940_v45 = vmul.f32 %v1358_v16, %v938_v43 }
0x1148   :  { %v1001_v34 = vrot.slane %v940_v45, 4 }
0x114a   :  { %1002 = vrot.lane.b32.xlu2 %v1001_v34, %s1502_s16  ;;  %v1251_v34 = vld [vmem:[%s1917_s8] ss:$0 sm:$0xff] }
0x118f   :  { %v998_v49 = vpop.permute.xlu1 %997 }
0x1191   :  { %v1055_v48 = vpop.permute.xlu0 %1054 }
0x1192   :  { %1217 = vmatmul.msk.f32.vlgmr.msra.gmra.mxu1 %vm263_vm11, %v1055_v48 }
0x11a4   :  { %v1003_v51 = vpop.permute.xlu2 %1002 }
0x11a5   :  { %v1005_v52 = vsel %vm263_vm11, %v998_v49, %v1003_v51 }
0x11a6   :  { %v1007_v53 = vrot.slane %v1005_v52, 4 }
0x11a8   :  { %1216 = vmatmul.msk.f32.vlgmr.msrb.gmra.mxu3 %vm345_vm12, %v1007_v53  ;;  %v1252_v53 = vld [vmem:[#allocation3] ss:$0 sm:$0xff] }
0x120f   :  { %v1075_v55 = vpop.f32.mrf.mxu1 }
0x1210   :  { %v1079_v12 = vrot.slane %v1075_v55, 2 }
0x1212   :  { %v1081_v57 = vadd.f32 %v1079_v12, %v1839_v56  ;;  %v1186_v12 = vrot.slane %v1587_v37, 2 }
0x1214   :  { %1363 = vtanh.f32 %v1081_v57  ;;  %v1082_v31 = vsub.f32 0.0, %v1081_v57 }
0x1216   :  { %v1083_v32 = vmul.f32 1.442695, %v1082_v31 }
0x121a   :  { %v1364_v27 = vpop.eup %1363 }
0x121b   :  { %1093 = vrot.lane.b32.xlu2 %v1364_v27, %s1502_s16  ;;  %v1190_v27 = vrot.slane %v1579_v11, 2 }
0x122b   :  { %v1027_v28 = vpop.f32.mrf.mxu3 }
0x122c   :  { %v1028_v29 = vadd.f32 %v1719_v41, %v1027_v28 }
0x122e   :  { %1365 = vtanh.f32 %v1028_v29  ;;  %v1030_v58 = vsub.f32 0.0, %v1028_v29 }
0x122f   :  { %1367 = vpow2.f32 %v1083_v32 }
0x1230   :  { %v1031_v59 = vmul.f32 1.442695, %v1030_v58 }
0x1234   :  { %v1366_v30 = vpop.eup %1365 }
0x1235   :  { %1038 = vrot.lane.b32.xlu1 %v1366_v30, %s1502_s16  ;;  %v1368_v33 = vpop.eup %1367 }
0x1236   :  { %v1085_v38 = vadd.f32 1.0, %v1368_v33 }
0x1238   :  { %1369 = vrcp.f32 %v1085_v38 }
0x1239   :  { %1371 = vpow2.f32 %v1031_v59 }
0x123e   :  { %v1370_v9 = vpop.eup %1369 }
0x123f   :  { %v1372_v60 = vpop.eup %1371  ;;  %v1091_v1 = vmul.f32 %v1370_v9, %v1089_v0 }
0x1240   :  { %v1033_v19 = vadd.f32 1.0, %v1372_v60 }
0x1242   :  { %1373 = vrcp.f32 %v1033_v19 }
0x1248   :  { %v1374_v61 = vpop.eup %1373 }
0x1249   :  { %v1036_v54 = vmul.f32 %v1374_v61, %v934_v35 }
0x1275   :  { %v1094_v4 = vpop.permute.xlu2 %1093 }
0x1276   :  { %v1096_v56 = vmul.f32 %v1370_v9, %v1094_v4 }
0x1278   :  { %1098 = vrot.lane.b32.xlu1 %v1096_v56, %s1503_s5 }
0x12a7   :  { %v1039_v62 = vpop.permute.xlu1 %1038 }
0x12a8   :  { %v1041_v63 = vmul.f32 %v1374_v61, %v1039_v62 }
0x12aa   :  { %1043 = vrot.lane.b32.xlu0 %v1041_v63, %s1503_s5 }
0x12ea   :  { %v1099_v2 = vpop.permute.xlu1 %1098 }
0x12eb   :  { %v1101_v50 = vadd.f32 %v1099_v2, %v1091_v1 }
0x12ed   :  { %1375 = vtanh.f32 %v1101_v50 }
0x12f3   :  { %v1376_v3 = vpop.eup %1375 }
0x12f4   :  { %1104 = vrot.lane.b32.xlu0 %v1376_v3, %s1502_s16 }
0x131c   :  { %v1044_v5 = vpop.permute.xlu0 %1043 }
0x131d   :  { %v1046_v6 = vadd.f32 %v1044_v5, %v1036_v54 }
0x131f   :  { %1377 = vtanh.f32 %v1046_v6 }
0x1325   :  { %v1378_v42 = vpop.eup %1377 }
0x1326   :  { %1049 = vrot.lane.b32.xlu2 %v1378_v42, %s1502_s16 }
0x1366   :  { %v1105_v44 = vpop.permute.xlu0 %1104 }
0x1367   :  { %v1107_v46 = vmul.f32 %v1370_v9, %v1105_v44 }
0x1369   :  { %1109 = vrot.lane.b32.xlu1 %v1107_v46, %s1503_s5 }
0x1380   :  { %v1050_v47 = vpop.permute.xlu2 %1049 }
0x1381   :  { %v1052_v7 = vmul.f32 %v1374_v61, %v1050_v47 }
0x1383   :  { %v1113_v8 = vrot.slane %v1052_v7, 2 }
0x1385   :  { %1114 = vrot.lane.b32.xlu2 %v1113_v8, %s1502_s16 }
0x13db   :  { %v1110_v10 = vpop.permute.xlu1 %1109 }
0x13df   :  { %v1115_v14 = vpop.permute.xlu2 %1114 }
0x13e0   :  { %v1117_v15 = vsel %vm263_vm11, %v1110_v10, %v1115_v14 }
0x13e1   :  { %v1119_v16 = vrot.slane %v1117_v15, 6 }
0x13e3   :  { %1218 = vmatmul.msk.f32.vlgmr.msrb.gmra.mxu2 %vm345_vm12, %v1119_v16 }
0x1466   :  { %v1139_v17 = vpop.f32.mrf.mxu2 }
0x1467   :  { %v1140_v13 = vadd.f32 %v1719_v41, %v1139_v17 }
0x1469   :  { %1379 = vtanh.f32 %v1140_v13  ;;  %v1142_v20 = vsub.f32 0.0, %v1140_v13 }
0x146b   :  { %v1143_v21 = vmul.f32 1.442695, %v1142_v20 }
0x146d   :  { %1381 = vpow2.f32 %v1143_v21 }
0x146f   :  { %v1380_v18 = vpop.eup %1379 }
0x1470   :  { %1150 = vrot.lane.b32.xlu0 %v1380_v18, %s1502_s16 }
0x1473   :  { %v1382_v22 = vpop.eup %1381 }
0x1474   :  { %v1145_v23 = vadd.f32 1.0, %v1382_v22 }
0x1476   :  { %1383 = vrcp.f32 %v1145_v23 }
0x147c   :  { %v1384_v24 = vpop.eup %1383 }
0x147d   :  { %v1148_v25 = vmul.f32 %v1384_v24, %v1046_v6 }
0x14e2   :  { %v1151_v26 = vpop.permute.xlu0 %1150 }
0x14e3   :  { %v1153_v35 = vmul.f32 %v1384_v24, %v1151_v26 }
0x14e5   :  { %1155 = vrot.lane.b32.xlu1 %v1153_v35, %s1503_s5 }
0x1557   :  { %v1156_v36 = vpop.permute.xlu1 %1155 }
0x1558   :  { %v1158_v39 = vadd.f32 %v1156_v36, %v1148_v25 }
0x155a   :  { %1385 = vtanh.f32 %v1158_v39 }
0x1560   :  { %v1386_v41 = vpop.eup %1385 }
0x1561   :  { %1161 = vrot.lane.b32.xlu2 %v1386_v41, %s1502_s16 }
0x15bb   :  { %v1162_v40 = vpop.permute.xlu2 %1161 }
0x15bc   :  { %v1164_v43 = vmul.f32 %v1384_v24, %v1162_v40 }
0x15be   :  { %v1166_v45 = vrot.slane %v1164_v43, 2 }
0x15c0   :  { %1167 = vrot.lane.b32.xlu0 %v1166_v45, %s1502_s16 }
0x1632   :  { %v1168_v48 = vpop.permute.xlu0 %1167 }
0x1633   :  { %v1170_v49 = vsel %vm263_vm11, %v1110_v10, %v1168_v48 }
0x1634   :  { %v1175_v51 = vmul.f32 %v1251_v34, %v1170_v49 }
0x1636   :  { %v1177_v52 = vsel %vm1176_vm13, %v1175_v51, 0.0 }
0x1637   :  { %1178 = vadd.xlane.f32.xlu1 %v1177_v52 }
0x16aa   :  { %v1179_v55 = vpop.xlane.xlu1 %1178 }
0x16ab   :  { %v1184_v57 = vadd.f32 %v1252_v53, %v1179_v55 }
0x16ad   :  { %v1188_v28 = vmul.f32 %v1186_v12, %v1184_v57 }
0x16af   :  { %v1192_v29 = vadd.f32 %v1190_v27, %v1188_v28 }
0x16b1   :  { %1194 = vst.msk [vmem:[%s1919_s10 - $0x6] sm:$0xc0] %vm1193_vm14, %v1192_v29 }
0x16b2   :  { %1199 = vsyncpa [#allocation5], 1 }
0x16b3   :  { %1200 = vsyncpa [#allocation7], 1 }
0x16b4   :  { %1201 = vsyncpa [#allocation10], 1 }

</bundles_post_ra>
